<compile_context>
chip_gen: v6e
topology: v6e:2x2x1
jax: 0.10.0
libtpu: 0.0.40
codegen_flags: <defaults>
</compile_context>

<pallas_src>
import functools

import jax
import jax.numpy as jnp
from jax import lax
from jax.experimental import pallas as pl
from jax.experimental.pallas import tpu as pltpu


def _lstm_tagger_kernel(
    x_ref,        # (S, D)      input sequence
    wih0_ref,     # (D, 4H)     layer-0 input->gates (transposed)
    b0_ref,       # (1, 4H)     layer-0 bias (b_ih + b_hh)
    whh0_ref,     # (H, 4H)     layer-0 hidden->gates (transposed)
    w1_ref,       # (2H, 4H)    layer-1 fused [W_ih1; W_hh1] (transposed, stacked)
    b1_ref,       # (1, 4H)     layer-1 bias (b_ih + b_hh)
    wfc_ref,      # (H, T)      fc weight (transposed)
    bfc_ref,      # (1, T)      fc bias
    h0_ref,       # (2, H)      initial h per layer
    c0_ref,       # (2, H)      initial c per layer
    y_ref,        # (1, T)      sigmoid(fc(h2_final))   [output]
    hn_ref,       # (2, H)      final h per layer       [output]
    cn_ref,       # (2, H)      final c per layer       [output]
    xg0_ref,      # (S, 4H)     scratch: precomputed layer-0 input projection
):
    H = whh0_ref.shape[0]
    S = x_ref.shape[0]

    # Hoist weight/bias loads: keep them resident in vregs across the whole
    # (unrolled) recurrence instead of reloading every iteration.
    whh0 = whh0_ref[...]
    w1 = w1_ref[...]
    b1 = b1_ref[...]

    # Hoisted layer-0 input projection for all timesteps at once:
    # one (S, D) x (D, 4H) matmul instead of S M=1 matmuls inside the loop.
    xg0_ref[...] = (
        jnp.dot(x_ref[...], wih0_ref[...], preferred_element_type=jnp.float32)
        + b0_ref[...]
    )

    def gates_to_hc(gates, c_prev):
        # One full-vreg sigmoid + one full-vreg tanh on the (1, 4H) gate row,
        # then slice the four H-wide chunks (PyTorch order [i, f, g, o]).
        sig = jax.nn.sigmoid(gates)
        tnh = jnp.tanh(gates)
        i_g = sig[:, 0 * H:1 * H]
        f_g = sig[:, 1 * H:2 * H]
        g_g = tnh[:, 2 * H:3 * H]
        o_g = sig[:, 3 * H:4 * H]
        c_new = f_g * c_prev + i_g * g_g
        h_new = o_g * jnp.tanh(c_new)
        return h_new, c_new

    def step(t, carry):
        h1, c1, h2, c2 = carry
        # Layer 0: input projection precomputed; only the hidden projection remains.
        g0 = xg0_ref[pl.ds(t, 1), :] + jnp.dot(
            h1, whh0, preferred_element_type=jnp.float32)
        h1, c1 = gates_to_hc(g0, c1)
        # Layer 1: fused single dot  [h1, h2_prev] (1, 2H) @ [Wih1; Whh1] (2H, 4H).
        x1 = jnp.concatenate([h1, h2], axis=-1)            # (1, 2H)
        g1 = jnp.dot(x1, w1, preferred_element_type=jnp.float32) + b1
        h2, c2 = gates_to_hc(g1, c2)
        return (h1, c1, h2, c2)

    h1 = h0_ref[0:1, :]
    c1 = c0_ref[0:1, :]
    h2 = h0_ref[1:2, :]
    c2 = c0_ref[1:2, :]

    # S is small and static: fully unroll so the LLO scheduler can overlap
    # step-t MXU pushes with step-t nonlinearities.
    h1, c1, h2, c2 = lax.fori_loop(0, S, step, (h1, c1, h2, c2), unroll=True)

    # Only scores[S-1, T-1] is consumed downstream (`.view(1,-1)[:, -1]`), so the
    # FC + sigmoid on the final top-layer hidden state is numerically identical
    # to the per-timestep version.
    y = jnp.dot(h2, wfc_ref[...], preferred_element_type=jnp.float32) + bfc_ref[...]
    y_ref[...] = jax.nn.sigmoid(y)

    hn_ref[0:1, :] = h1
    hn_ref[1:2, :] = h2
    cn_ref[0:1, :] = c1
    cn_ref[1:2, :] = c2


def _full_spec(shape):
    # whole-array block (block_shape == array shape), grid=(1,)
    return pl.BlockSpec(shape, lambda i: tuple(0 for _ in shape))


@functools.partial(jax.jit, static_argnames=())
def lstm_tagger_forward(record, hidden, params):
    """Replicates LSTMTagger.forward(record, hidden).

    record: (seq, input_dim) float32
    hidden: (h0, c0), each (n_layers=2, 1, hidden_dim) float32
    returns: (tag_scores (1,), (h_n, c_n)) matching PyTorch shapes.
    """
    h0, c0 = hidden
    S, D = record.shape
    H = params["w_hh_l0"].shape[1]
    T = params["fc_w"].shape[0]

    # Pre-transpose weights to (in, out); fold the two LSTM biases; fuse layer-1
    # input/hidden weights so the kernel does a single dot per cell.
    wih0 = params["w_ih_l0"].T                                    # (D, 4H)
    whh0 = params["w_hh_l0"].T                                    # (H, 4H)
    b0 = (params["b_ih_l0"] + params["b_hh_l0"]).reshape(1, 4 * H)
    w1 = jnp.concatenate(
        [params["w_ih_l1"].T, params["w_hh_l1"].T], axis=0)       # (2H, 4H)
    b1 = (params["b_ih_l1"] + params["b_hh_l1"]).reshape(1, 4 * H)
    wfc = params["fc_w"].T                                        # (H, T)
    bfc = params["fc_b"].reshape(1, T)

    h0_2d = h0.reshape(2, H)
    c0_2d = c0.reshape(2, H)

    in_arrays = (record, wih0, b0, whh0, w1, b1, wfc, bfc, h0_2d, c0_2d)

    y, h_n, c_n = pl.pallas_call(
        _lstm_tagger_kernel,
        grid=(1,),
        in_specs=[_full_spec(a.shape) for a in in_arrays],
        out_specs=[
            _full_spec((1, T)),
            _full_spec((2, H)),
            _full_spec((2, H)),
        ],
        out_shape=[
            jax.ShapeDtypeStruct((1, T), jnp.float32),
            jax.ShapeDtypeStruct((2, H), jnp.float32),
            jax.ShapeDtypeStruct((2, H), jnp.float32),
        ],
        scratch_shapes=[pltpu.VMEM((S, 4 * H), jnp.float32)],
        compiler_params=pltpu.CompilerParams(
            dimension_semantics=("arbitrary",)),
    )(*in_arrays)

    # tag_scores = sigmoid(fc(lstm_out)).view(1, -1)[:, -1]
    #            = sigmoid(fc(h2_final))[:, -1]                  -> shape (1,)
    tag_scores = y[:, -1]
    return tag_scores, (h_n.reshape(2, 1, H), c_n.reshape(2, 1, H))


def init_params(key, input_dim, hidden_dim, tagset_size):
    """Deterministic init matching nn.LSTM / nn.Linear parameter shapes."""
    ks = jax.random.split(key, 10)
    bound = 1.0 / jnp.sqrt(hidden_dim)

    def u(k, shape):
        return jax.random.uniform(k, shape, jnp.float32, -bound, bound)

    return {
        "w_ih_l0": u(ks[0], (4 * hidden_dim, input_dim)),
        "w_hh_l0": u(ks[1], (4 * hidden_dim, hidden_dim)),
        "b_ih_l0": u(ks[2], (4 * hidden_dim,)),
        "b_hh_l0": u(ks[3], (4 * hidden_dim,)),
        "w_ih_l1": u(ks[4], (4 * hidden_dim, hidden_dim)),
        "w_hh_l1": u(ks[5], (4 * hidden_dim, hidden_dim)),
        "b_ih_l1": u(ks[6], (4 * hidden_dim,)),
        "b_hh_l1": u(ks[7], (4 * hidden_dim,)),
        "fc_w": u(ks[8], (tagset_size, hidden_dim)),
        "fc_b": u(ks[9], (tagset_size,)),
    }


if __name__ == "__main__":
    SEQ, INPUT_DIM, HIDDEN_DIM, TAGSET = 8, 16, 32, 8

    key = jax.random.PRNGKey(0)
    k_par, k_rec = jax.random.split(key)
    params = init_params(k_par, INPUT_DIM, HIDDEN_DIM, TAGSET)

    record = jax.random.normal(k_rec, (SEQ, INPUT_DIM), jnp.float32)
    hidden = (
        jnp.zeros((2, 1, HIDDEN_DIM), jnp.float32),   # init_hidden(): h0
        jnp.zeros((2, 1, HIDDEN_DIM), jnp.float32),   # init_hidden(): c0
    )

    tag_scores, (h_n, c_n) = lstm_tagger_forward(record, hidden, params)
    jax.block_until_ready((tag_scores, h_n, c_n))

    assert tag_scores.shape == (1,)
    assert h_n.shape == (2, 1, HIDDEN_DIM) and c_n.shape == (2, 1, HIDDEN_DIM)
    print("KERNEL_OK")
</pallas_src>

<mosaic_0001>
module attributes {stable_mosaic.version = 11 : i64} {
  func.func @_lstm_tagger_kernel(%arg0: i32, %arg1: memref<8x16xf32, #tpu.memory_space<vmem>>, %arg2: memref<16x128xf32, #tpu.memory_space<vmem>>, %arg3: memref<1x128xf32, #tpu.memory_space<vmem>>, %arg4: memref<32x128xf32, #tpu.memory_space<vmem>>, %arg5: memref<64x128xf32, #tpu.memory_space<vmem>>, %arg6: memref<1x128xf32, #tpu.memory_space<vmem>>, %arg7: memref<32x8xf32, #tpu.memory_space<vmem>>, %arg8: memref<1x8xf32, #tpu.memory_space<vmem>>, %arg9: memref<2x32xf32, #tpu.memory_space<vmem>>, %arg10: memref<2x32xf32, #tpu.memory_space<vmem>>, %arg11: memref<1x8xf32, #tpu.memory_space<vmem>>, %arg12: memref<2x32xf32, #tpu.memory_space<vmem>>, %arg13: memref<2x32xf32, #tpu.memory_space<vmem>>, %arg14: memref<8x128xf32, #tpu.memory_space<vmem>>) attributes {dimension_semantics = [#tpu.dimension_semantics<arbitrary>], iteration_bounds = array<i64: 1>, scalar_prefetch = 0 : i64, scratch_operands = 1 : i64, tpu.core_type = #tpu.core_type<tc>, window_params = [{pipeline_mode = #tpu.pipeline_mode<synchronous>, transform_indices = @transform_0, window_bounds = array<i64: 8, 16>}, {pipeline_mode = #tpu.pipeline_mode<synchronous>, transform_indices = @transform_1, window_bounds = array<i64: 16, 128>}, {pipeline_mode = #tpu.pipeline_mode<synchronous>, transform_indices = @transform_2, window_bounds = array<i64: 1, 128>}, {pipeline_mode = #tpu.pipeline_mode<synchronous>, transform_indices = @transform_3, window_bounds = array<i64: 32, 128>}, {pipeline_mode = #tpu.pipeline_mode<synchronous>, transform_indices = @transform_4, window_bounds = array<i64: 64, 128>}, {pipeline_mode = #tpu.pipeline_mode<synchronous>, transform_indices = @transform_5, window_bounds = array<i64: 1, 128>}, {pipeline_mode = #tpu.pipeline_mode<synchronous>, transform_indices = @transform_6, window_bounds = array<i64: 32, 8>}, {pipeline_mode = #tpu.pipeline_mode<synchronous>, transform_indices = @transform_7, window_bounds = array<i64: 1, 8>}, {pipeline_mode = #tpu.pipeline_mode<synchronous>, transform_indices = @transform_8, window_bounds = array<i64: 2, 32>}, {pipeline_mode = #tpu.pipeline_mode<synchronous>, transform_indices = @transform_9, window_bounds = array<i64: 2, 32>}, {pipeline_mode = #tpu.pipeline_mode<synchronous>, transform_indices = @transform_10, window_bounds = array<i64: 1, 8>}, {pipeline_mode = #tpu.pipeline_mode<synchronous>, transform_indices = @transform_11, window_bounds = array<i64: 2, 32>}, {pipeline_mode = #tpu.pipeline_mode<synchronous>, transform_indices = @transform_12, window_bounds = array<i64: 2, 32>}]} {
    %c0 = arith.constant 0 : index
    %c0_0 = arith.constant 0 : index
    %0 = vector.load %arg4[%c0, %c0_0] : memref<32x128xf32, #tpu.memory_space<vmem>>, vector<32x128xf32>
    %c0_1 = arith.constant 0 : index
    %c0_2 = arith.constant 0 : index
    %1 = vector.load %arg5[%c0_1, %c0_2] : memref<64x128xf32, #tpu.memory_space<vmem>>, vector<64x128xf32>
    %c0_3 = arith.constant 0 : index
    %c0_4 = arith.constant 0 : index
    %2 = vector.load %arg6[%c0_3, %c0_4] : memref<1x128xf32, #tpu.memory_space<vmem>>, vector<1x128xf32>
    %c0_5 = arith.constant 0 : index
    %c0_6 = arith.constant 0 : index
    %3 = vector.load %arg1[%c0_5, %c0_6] : memref<8x16xf32, #tpu.memory_space<vmem>>, vector<8x16xf32>
    %c0_7 = arith.constant 0 : index
    %c0_8 = arith.constant 0 : index
    %4 = vector.load %arg2[%c0_7, %c0_8] : memref<16x128xf32, #tpu.memory_space<vmem>>, vector<16x128xf32>
    %cst = arith.constant dense<0.000000e+00> : vector<8x128xf32>
    %5 = tpu.matmul %3, %4, %cst {dimension_numbers = #tpu.dot_dimension_numbers<[1], [0], [0], [1], [0, 0, 1, 1], [], []>} : vector<8x16xf32>, vector<16x128xf32>, vector<8x128xf32> -> vector<8x128xf32>
    %c0_9 = arith.constant 0 : index
    %c0_10 = arith.constant 0 : index
    %6 = vector.load %arg3[%c0_9, %c0_10] : memref<1x128xf32, #tpu.memory_space<vmem>>, vector<1x128xf32>
    %7 = vector.broadcast %6 : vector<1x128xf32> to vector<8x128xf32>
    %8 = arith.addf %5, %7 : vector<8x128xf32>
    %c0_11 = arith.constant 0 : index
    %c0_12 = arith.constant 0 : index
    %9 = vector.load %arg14[%c0_11, %c0_12] : memref<8x128xf32, #tpu.memory_space<vmem>>, vector<8x128xf32>
    tpu.vector_store %arg14[%c0_11, %c0_12], %8 {strides = array<i32>} : memref<8x128xf32, #tpu.memory_space<vmem>>, vector<8x128xf32>,
    %c0_13 = arith.constant 0 : index
    %c0_14 = arith.constant 0 : index
    %10 = vector.load %arg9[%c0_13, %c0_14] : memref<2x32xf32, #tpu.memory_space<vmem>>, vector<1x32xf32>
    %c0_15 = arith.constant 0 : index
    %c0_16 = arith.constant 0 : index
    %11 = vector.load %arg10[%c0_15, %c0_16] : memref<2x32xf32, #tpu.memory_space<vmem>>, vector<1x32xf32>
    %c1 = arith.constant 1 : index
    %c0_17 = arith.constant 0 : index
    %12 = vector.load %arg9[%c1, %c0_17] : memref<2x32xf32, #tpu.memory_space<vmem>>, vector<1x32xf32>
    %c1_18 = arith.constant 1 : index
    %c0_19 = arith.constant 0 : index
    %13 = vector.load %arg10[%c1_18, %c0_19] : memref<2x32xf32, #tpu.memory_space<vmem>>, vector<1x32xf32>
    %c0_i32 = arith.constant 0 : i32
    %14 = arith.index_cast %c0_i32 : i32 to index
    %c0_20 = arith.constant 0 : index
    %15 = vector.load %arg14[%14, %c0_20] : memref<8x128xf32, #tpu.memory_space<vmem>>, vector<1x128xf32>
    %cst_21 = arith.constant dense<0.000000e+00> : vector<1x128xf32>
    %16 = tpu.matmul %10, %0, %cst_21 {dimension_numbers = #tpu.dot_dimension_numbers<[1], [0], [0], [1], [0, 0, 1, 1], [], []>} : vector<1x32xf32>, vector<32x128xf32>, vector<1x128xf32> -> vector<1x128xf32>
    %17 = arith.addf %15, %16 : vector<1x128xf32>
    %18 = arith.negf %17 : vector<1x128xf32>
    %19 = math.exp %18 : vector<1x128xf32>
    %cst_22 = arith.constant 1.000000e+00 : f32
    %20 = vector.broadcast %cst_22 : f32 to vector<1x128xf32>
    %21 = arith.addf %20, %19 : vector<1x128xf32>
    %22 = arith.divf %20, %21 : vector<1x128xf32>
    %23 = math.tanh %17 : vector<1x128xf32>
    %24 = vector.extract_strided_slice %22 {offsets = [0, 0], sizes = [1, 32], strides = [1, 1]} : vector<1x128xf32> to vector<1x32xf32>
    %25 = vector.extract_strided_slice %22 {offsets = [0, 32], sizes = [1, 32], strides = [1, 1]} : vector<1x128xf32> to vector<1x32xf32>
    %26 = vector.extract_strided_slice %23 {offsets = [0, 64], sizes = [1, 32], strides = [1, 1]} : vector<1x128xf32> to vector<1x32xf32>
    %27 = vector.extract_strided_slice %22 {offsets = [0, 96], sizes = [1, 32], strides = [1, 1]} : vector<1x128xf32> to vector<1x32xf32>
    %28 = arith.mulf %25, %11 : vector<1x32xf32>
    %29 = arith.mulf %24, %26 : vector<1x32xf32>
    %30 = arith.addf %28, %29 : vector<1x32xf32>
    %31 = math.tanh %30 : vector<1x32xf32>
    %32 = arith.mulf %27, %31 : vector<1x32xf32>
    %33 = tpu.concatenate %32, %12 in 1 : vector<1x32xf32>, vector<1x32xf32> -> vector<1x64xf32>
    %cst_23 = arith.constant dense<0.000000e+00> : vector<1x128xf32>
    %34 = tpu.matmul %33, %1, %cst_23 {dimension_numbers = #tpu.dot_dimension_numbers<[1], [0], [0], [1], [0, 0, 1, 1], [], []>} : vector<1x64xf32>, vector<64x128xf32>, vector<1x128xf32> -> vector<1x128xf32>
    %35 = arith.addf %34, %2 : vector<1x128xf32>
    %36 = arith.negf %35 : vector<1x128xf32>
    %37 = math.exp %36 : vector<1x128xf32>
    %cst_24 = arith.constant 1.000000e+00 : f32
    %38 = vector.broadcast %cst_24 : f32 to vector<1x128xf32>
    %39 = arith.addf %38, %37 : vector<1x128xf32>
    %40 = arith.divf %38, %39 : vector<1x128xf32>
    %41 = math.tanh %35 : vector<1x128xf32>
    %42 = vector.extract_strided_slice %40 {offsets = [0, 0], sizes = [1, 32], strides = [1, 1]} : vector<1x128xf32> to vector<1x32xf32>
    %43 = vector.extract_strided_slice %40 {offsets = [0, 32], sizes = [1, 32], strides = [1, 1]} : vector<1x128xf32> to vector<1x32xf32>
    %44 = vector.extract_strided_slice %41 {offsets = [0, 64], sizes = [1, 32], strides = [1, 1]} : vector<1x128xf32> to vector<1x32xf32>
    %45 = vector.extract_strided_slice %40 {offsets = [0, 96], sizes = [1, 32], strides = [1, 1]} : vector<1x128xf32> to vector<1x32xf32>
    %46 = arith.mulf %43, %13 : vector<1x32xf32>
    %47 = arith.mulf %42, %44 : vector<1x32xf32>
    %48 = arith.addf %46, %47 : vector<1x32xf32>
    %49 = math.tanh %48 : vector<1x32xf32>
    %50 = arith.mulf %45, %49 : vector<1x32xf32>
    %c1_i32 = arith.constant 1 : i32
    %51 = arith.index_cast %c1_i32 : i32 to index
    %c0_25 = arith.constant 0 : index
    %52 = vector.load %arg14[%51, %c0_25] : memref<8x128xf32, #tpu.memory_space<vmem>>, vector<1x128xf32>
    %cst_26 = arith.constant dense<0.000000e+00> : vector<1x128xf32>
    %53 = tpu.matmul %32, %0, %cst_26 {dimension_numbers = #tpu.dot_dimension_numbers<[1], [0], [0], [1], [0, 0, 1, 1], [], []>} : vector<1x32xf32>, vector<32x128xf32>, vector<1x128xf32> -> vector<1x128xf32>
    %54 = arith.addf %52, %53 : vector<1x128xf32>
    %55 = arith.negf %54 : vector<1x128xf32>
    %56 = math.exp %55 : vector<1x128xf32>
    %cst_27 = arith.constant 1.000000e+00 : f32
    %57 = vector.broadcast %cst_27 : f32 to vector<1x128xf32>
    %58 = arith.addf %57, %56 : vector<1x128xf32>
    %59 = arith.divf %57, %58 : vector<1x128xf32>
    %60 = math.tanh %54 : vector<1x128xf32>
    %61 = vector.extract_strided_slice %59 {offsets = [0, 0], sizes = [1, 32], strides = [1, 1]} : vector<1x128xf32> to vector<1x32xf32>
    %62 = vector.extract_strided_slice %59 {offsets = [0, 32], sizes = [1, 32], strides = [1, 1]} : vector<1x128xf32> to vector<1x32xf32>
    %63 = vector.extract_strided_slice %60 {offsets = [0, 64], sizes = [1, 32], strides = [1, 1]} : vector<1x128xf32> to vector<1x32xf32>
    %64 = vector.extract_strided_slice %59 {offsets = [0, 96], sizes = [1, 32], strides = [1, 1]} : vector<1x128xf32> to vector<1x32xf32>
    %65 = arith.mulf %62, %30 : vector<1x32xf32>
    %66 = arith.mulf %61, %63 : vector<1x32xf32>
    %67 = arith.addf %65, %66 : vector<1x32xf32>
    %68 = math.tanh %67 : vector<1x32xf32>
    %69 = arith.mulf %64, %68 : vector<1x32xf32>
    %70 = tpu.concatenate %69, %50 in 1 : vector<1x32xf32>, vector<1x32xf32> -> vector<1x64xf32>
    %cst_28 = arith.constant dense<0.000000e+00> : vector<1x128xf32>
    %71 = tpu.matmul %70, %1, %cst_28 {dimension_numbers = #tpu.dot_dimension_numbers<[1], [0], [0], [1], [0, 0, 1, 1], [], []>} : vector<1x64xf32>, vector<64x128xf32>, vector<1x128xf32> -> vector<1x128xf32>
    %72 = arith.addf %71, %2 : vector<1x128xf32>
    %73 = arith.negf %72 : vector<1x128xf32>
    %74 = math.exp %73 : vector<1x128xf32>
    %cst_29 = arith.constant 1.000000e+00 : f32
    %75 = vector.broadcast %cst_29 : f32 to vector<1x128xf32>
    %76 = arith.addf %75, %74 : vector<1x128xf32>
    %77 = arith.divf %75, %76 : vector<1x128xf32>
    %78 = math.tanh %72 : vector<1x128xf32>
    %79 = vector.extract_strided_slice %77 {offsets = [0, 0], sizes = [1, 32], strides = [1, 1]} : vector<1x128xf32> to vector<1x32xf32>
    %80 = vector.extract_strided_slice %77 {offsets = [0, 32], sizes = [1, 32], strides = [1, 1]} : vector<1x128xf32> to vector<1x32xf32>
    %81 = vector.extract_strided_slice %78 {offsets = [0, 64], sizes = [1, 32], strides = [1, 1]} : vector<1x128xf32> to vector<1x32xf32>
    %82 = vector.extract_strided_slice %77 {offsets = [0, 96], sizes = [1, 32], strides = [1, 1]} : vector<1x128xf32> to vector<1x32xf32>
    %83 = arith.mulf %80, %48 : vector<1x32xf32>
    %84 = arith.mulf %79, %81 : vector<1x32xf32>
    %85 = arith.addf %83, %84 : vector<1x32xf32>
    %86 = math.tanh %85 : vector<1x32xf32>
    %87 = arith.mulf %82, %86 : vector<1x32xf32>
    %c2_i32 = arith.constant 2 : i32
    %88 = arith.index_cast %c2_i32 : i32 to index
    %c0_30 = arith.constant 0 : index
    %89 = vector.load %arg14[%88, %c0_30] : memref<8x128xf32, #tpu.memory_space<vmem>>, vector<1x128xf32>
    %cst_31 = arith.constant dense<0.000000e+00> : vector<1x128xf32>
    %90 = tpu.matmul %69, %0, %cst_31 {dimension_numbers = #tpu.dot_dimension_numbers<[1], [0], [0], [1], [0, 0, 1, 1], [], []>} : vector<1x32xf32>, vector<32x128xf32>, vector<1x128xf32> -> vector<1x128xf32>
    %91 = arith.addf %89, %90 : vector<1x128xf32>
    %92 = arith.negf %91 : vector<1x128xf32>
    %93 = math.exp %92 : vector<1x128xf32>
    %cst_32 = arith.constant 1.000000e+00 : f32
    %94 = vector.broadcast %cst_32 : f32 to vector<1x128xf32>
    %95 = arith.addf %94, %93 : vector<1x128xf32>
    %96 = arith.divf %94, %95 : vector<1x128xf32>
    %97 = math.tanh %91 : vector<1x128xf32>
    %98 = vector.extract_strided_slice %96 {offsets = [0, 0], sizes = [1, 32], strides = [1, 1]} : vector<1x128xf32> to vector<1x32xf32>
    %99 = vector.extract_strided_slice %96 {offsets = [0, 32], sizes = [1, 32], strides = [1, 1]} : vector<1x128xf32> to vector<1x32xf32>
    %100 = vector.extract_strided_slice %97 {offsets = [0, 64], sizes = [1, 32], strides = [1, 1]} : vector<1x128xf32> to vector<1x32xf32>
    %101 = vector.extract_strided_slice %96 {offsets = [0, 96], sizes = [1, 32], strides = [1, 1]} : vector<1x128xf32> to vector<1x32xf32>
    %102 = arith.mulf %99, %67 : vector<1x32xf32>
    %103 = arith.mulf %98, %100 : vector<1x32xf32>
    %104 = arith.addf %102, %103 : vector<1x32xf32>
    %105 = math.tanh %104 : vector<1x32xf32>
    %106 = arith.mulf %101, %105 : vector<1x32xf32>
    %107 = tpu.concatenate %106, %87 in 1 : vector<1x32xf32>, vector<1x32xf32> -> vector<1x64xf32>
    %cst_33 = arith.constant dense<0.000000e+00> : vector<1x128xf32>
    %108 = tpu.matmul %107, %1, %cst_33 {dimension_numbers = #tpu.dot_dimension_numbers<[1], [0], [0], [1], [0, 0, 1, 1], [], []>} : vector<1x64xf32>, vector<64x128xf32>, vector<1x128xf32> -> vector<1x128xf32>
    %109 = arith.addf %108, %2 : vector<1x128xf32>
    %110 = arith.negf %109 : vector<1x128xf32>
    %111 = math.exp %110 : vector<1x128xf32>
    %cst_34 = arith.constant 1.000000e+00 : f32
    %112 = vector.broadcast %cst_34 : f32 to vector<1x128xf32>
    %113 = arith.addf %112, %111 : vector<1x128xf32>
    %114 = arith.divf %112, %113 : vector<1x128xf32>
    %115 = math.tanh %109 : vector<1x128xf32>
    %116 = vector.extract_strided_slice %114 {offsets = [0, 0], sizes = [1, 32], strides = [1, 1]} : vector<1x128xf32> to vector<1x32xf32>
    %117 = vector.extract_strided_slice %114 {offsets = [0, 32], sizes = [1, 32], strides = [1, 1]} : vector<1x128xf32> to vector<1x32xf32>
    %118 = vector.extract_strided_slice %115 {offsets = [0, 64], sizes = [1, 32], strides = [1, 1]} : vector<1x128xf32> to vector<1x32xf32>
    %119 = vector.extract_strided_slice %114 {offsets = [0, 96], sizes = [1, 32], strides = [1, 1]} : vector<1x128xf32> to vector<1x32xf32>
    %120 = arith.mulf %117, %85 : vector<1x32xf32>
    %121 = arith.mulf %116, %118 : vector<1x32xf32>
    %122 = arith.addf %120, %121 : vector<1x32xf32>
    %123 = math.tanh %122 : vector<1x32xf32>
    %124 = arith.mulf %119, %123 : vector<1x32xf32>
    %c3_i32 = arith.constant 3 : i32
    %125 = arith.index_cast %c3_i32 : i32 to index
    %c0_35 = arith.constant 0 : index
    %126 = vector.load %arg14[%125, %c0_35] : memref<8x128xf32, #tpu.memory_space<vmem>>, vector<1x128xf32>
    %cst_36 = arith.constant dense<0.000000e+00> : vector<1x128xf32>
    %127 = tpu.matmul %106, %0, %cst_36 {dimension_numbers = #tpu.dot_dimension_numbers<[1], [0], [0], [1], [0, 0, 1, 1], [], []>} : vector<1x32xf32>, vector<32x128xf32>, vector<1x128xf32> -> vector<1x128xf32>
    %128 = arith.addf %126, %127 : vector<1x128xf32>
    %129 = arith.negf %128 : vector<1x128xf32>
    %130 = math.exp %129 : vector<1x128xf32>
    %cst_37 = arith.constant 1.000000e+00 : f32
    %131 = vector.broadcast %cst_37 : f32 to vector<1x128xf32>
    %132 = arith.addf %131, %130 : vector<1x128xf32>
    %133 = arith.divf %131, %132 : vector<1x128xf32>
    %134 = math.tanh %128 : vector<1x128xf32>
    %135 = vector.extract_strided_slice %133 {offsets = [0, 0], sizes = [1, 32], strides = [1, 1]} : vector<1x128xf32> to vector<1x32xf32>
    %136 = vector.extract_strided_slice %133 {offsets = [0, 32], sizes = [1, 32], strides = [1, 1]} : vector<1x128xf32> to vector<1x32xf32>
    %137 = vector.extract_strided_slice %134 {offsets = [0, 64], sizes = [1, 32], strides = [1, 1]} : vector<1x128xf32> to vector<1x32xf32>
    %138 = vector.extract_strided_slice %133 {offsets = [0, 96], sizes = [1, 32], strides = [1, 1]} : vector<1x128xf32> to vector<1x32xf32>
    %139 = arith.mulf %136, %104 : vector<1x32xf32>
    %140 = arith.mulf %135, %137 : vector<1x32xf32>
    %141 = arith.addf %139, %140 : vector<1x32xf32>
    %142 = math.tanh %141 : vector<1x32xf32>
    %143 = arith.mulf %138, %142 : vector<1x32xf32>
    %144 = tpu.concatenate %143, %124 in 1 : vector<1x32xf32>, vector<1x32xf32> -> vector<1x64xf32>
    %cst_38 = arith.constant dense<0.000000e+00> : vector<1x128xf32>
    %145 = tpu.matmul %144, %1, %cst_38 {dimension_numbers = #tpu.dot_dimension_numbers<[1], [0], [0], [1], [0, 0, 1, 1], [], []>} : vector<1x64xf32>, vector<64x128xf32>, vector<1x128xf32> -> vector<1x128xf32>
    %146 = arith.addf %145, %2 : vector<1x128xf32>
    %147 = arith.negf %146 : vector<1x128xf32>
    %148 = math.exp %147 : vector<1x128xf32>
    %cst_39 = arith.constant 1.000000e+00 : f32
    %149 = vector.broadcast %cst_39 : f32 to vector<1x128xf32>
    %150 = arith.addf %149, %148 : vector<1x128xf32>
    %151 = arith.divf %149, %150 : vector<1x128xf32>
    %152 = math.tanh %146 : vector<1x128xf32>
    %153 = vector.extract_strided_slice %151 {offsets = [0, 0], sizes = [1, 32], strides = [1, 1]} : vector<1x128xf32> to vector<1x32xf32>
    %154 = vector.extract_strided_slice %151 {offsets = [0, 32], sizes = [1, 32], strides = [1, 1]} : vector<1x128xf32> to vector<1x32xf32>
    %155 = vector.extract_strided_slice %152 {offsets = [0, 64], sizes = [1, 32], strides = [1, 1]} : vector<1x128xf32> to vector<1x32xf32>
    %156 = vector.extract_strided_slice %151 {offsets = [0, 96], sizes = [1, 32], strides = [1, 1]} : vector<1x128xf32> to vector<1x32xf32>
    %157 = arith.mulf %154, %122 : vector<1x32xf32>
    %158 = arith.mulf %153, %155 : vector<1x32xf32>
    %159 = arith.addf %157, %158 : vector<1x32xf32>
    %160 = math.tanh %159 : vector<1x32xf32>
    %161 = arith.mulf %156, %160 : vector<1x32xf32>
    %c4_i32 = arith.constant 4 : i32
    %162 = arith.index_cast %c4_i32 : i32 to index
    %c0_40 = arith.constant 0 : index
    %163 = vector.load %arg14[%162, %c0_40] : memref<8x128xf32, #tpu.memory_space<vmem>>, vector<1x128xf32>
    %cst_41 = arith.constant dense<0.000000e+00> : vector<1x128xf32>
    %164 = tpu.matmul %143, %0, %cst_41 {dimension_numbers = #tpu.dot_dimension_numbers<[1], [0], [0], [1], [0, 0, 1, 1], [], []>} : vector<1x32xf32>, vector<32x128xf32>, vector<1x128xf32> -> vector<1x128xf32>
    %165 = arith.addf %163, %164 : vector<1x128xf32>
    %166 = arith.negf %165 : vector<1x128xf32>
    %167 = math.exp %166 : vector<1x128xf32>
    %cst_42 = arith.constant 1.000000e+00 : f32
    %168 = vector.broadcast %cst_42 : f32 to vector<1x128xf32>
    %169 = arith.addf %168, %167 : vector<1x128xf32>
    %170 = arith.divf %168, %169 : vector<1x128xf32>
    %171 = math.tanh %165 : vector<1x128xf32>
    %172 = vector.extract_strided_slice %170 {offsets = [0, 0], sizes = [1, 32], strides = [1, 1]} : vector<1x128xf32> to vector<1x32xf32>
    %173 = vector.extract_strided_slice %170 {offsets = [0, 32], sizes = [1, 32], strides = [1, 1]} : vector<1x128xf32> to vector<1x32xf32>
    %174 = vector.extract_strided_slice %171 {offsets = [0, 64], sizes = [1, 32], strides = [1, 1]} : vector<1x128xf32> to vector<1x32xf32>
    %175 = vector.extract_strided_slice %170 {offsets = [0, 96], sizes = [1, 32], strides = [1, 1]} : vector<1x128xf32> to vector<1x32xf32>
    %176 = arith.mulf %173, %141 : vector<1x32xf32>
    %177 = arith.mulf %172, %174 : vector<1x32xf32>
    %178 = arith.addf %176, %177 : vector<1x32xf32>
    %179 = math.tanh %178 : vector<1x32xf32>
    %180 = arith.mulf %175, %179 : vector<1x32xf32>
    %181 = tpu.concatenate %180, %161 in 1 : vector<1x32xf32>, vector<1x32xf32> -> vector<1x64xf32>
    %cst_43 = arith.constant dense<0.000000e+00> : vector<1x128xf32>
    %182 = tpu.matmul %181, %1, %cst_43 {dimension_numbers = #tpu.dot_dimension_numbers<[1], [0], [0], [1], [0, 0, 1, 1], [], []>} : vector<1x64xf32>, vector<64x128xf32>, vector<1x128xf32> -> vector<1x128xf32>
    %183 = arith.addf %182, %2 : vector<1x128xf32>
    %184 = arith.negf %183 : vector<1x128xf32>
    %185 = math.exp %184 : vector<1x128xf32>
    %cst_44 = arith.constant 1.000000e+00 : f32
    %186 = vector.broadcast %cst_44 : f32 to vector<1x128xf32>
    %187 = arith.addf %186, %185 : vector<1x128xf32>
    %188 = arith.divf %186, %187 : vector<1x128xf32>
    %189 = math.tanh %183 : vector<1x128xf32>
    %190 = vector.extract_strided_slice %188 {offsets = [0, 0], sizes = [1, 32], strides = [1, 1]} : vector<1x128xf32> to vector<1x32xf32>
    %191 = vector.extract_strided_slice %188 {offsets = [0, 32], sizes = [1, 32], strides = [1, 1]} : vector<1x128xf32> to vector<1x32xf32>
    %192 = vector.extract_strided_slice %189 {offsets = [0, 64], sizes = [1, 32], strides = [1, 1]} : vector<1x128xf32> to vector<1x32xf32>
    %193 = vector.extract_strided_slice %188 {offsets = [0, 96], sizes = [1, 32], strides = [1, 1]} : vector<1x128xf32> to vector<1x32xf32>
    %194 = arith.mulf %191, %159 : vector<1x32xf32>
    %195 = arith.mulf %190, %192 : vector<1x32xf32>
    %196 = arith.addf %194, %195 : vector<1x32xf32>
    %197 = math.tanh %196 : vector<1x32xf32>
    %198 = arith.mulf %193, %197 : vector<1x32xf32>
    %c5_i32 = arith.constant 5 : i32
    %199 = arith.index_cast %c5_i32 : i32 to index
    %c0_45 = arith.constant 0 : index
    %200 = vector.load %arg14[%199, %c0_45] : memref<8x128xf32, #tpu.memory_space<vmem>>, vector<1x128xf32>
    %cst_46 = arith.constant dense<0.000000e+00> : vector<1x128xf32>
    %201 = tpu.matmul %180, %0, %cst_46 {dimension_numbers = #tpu.dot_dimension_numbers<[1], [0], [0], [1], [0, 0, 1, 1], [], []>} : vector<1x32xf32>, vector<32x128xf32>, vector<1x128xf32> -> vector<1x128xf32>
    %202 = arith.addf %200, %201 : vector<1x128xf32>
    %203 = arith.negf %202 : vector<1x128xf32>
    %204 = math.exp %203 : vector<1x128xf32>
    %cst_47 = arith.constant 1.000000e+00 : f32
    %205 = vector.broadcast %cst_47 : f32 to vector<1x128xf32>
    %206 = arith.addf %205, %204 : vector<1x128xf32>
    %207 = arith.divf %205, %206 : vector<1x128xf32>
    %208 = math.tanh %202 : vector<1x128xf32>
    %209 = vector.extract_strided_slice %207 {offsets = [0, 0], sizes = [1, 32], strides = [1, 1]} : vector<1x128xf32> to vector<1x32xf32>
    %210 = vector.extract_strided_slice %207 {offsets = [0, 32], sizes = [1, 32], strides = [1, 1]} : vector<1x128xf32> to vector<1x32xf32>
    %211 = vector.extract_strided_slice %208 {offsets = [0, 64], sizes = [1, 32], strides = [1, 1]} : vector<1x128xf32> to vector<1x32xf32>
    %212 = vector.extract_strided_slice %207 {offsets = [0, 96], sizes = [1, 32], strides = [1, 1]} : vector<1x128xf32> to vector<1x32xf32>
    %213 = arith.mulf %210, %178 : vector<1x32xf32>
    %214 = arith.mulf %209, %211 : vector<1x32xf32>
    %215 = arith.addf %213, %214 : vector<1x32xf32>
    %216 = math.tanh %215 : vector<1x32xf32>
    %217 = arith.mulf %212, %216 : vector<1x32xf32>
    %218 = tpu.concatenate %217, %198 in 1 : vector<1x32xf32>, vector<1x32xf32> -> vector<1x64xf32>
    %cst_48 = arith.constant dense<0.000000e+00> : vector<1x128xf32>
    %219 = tpu.matmul %218, %1, %cst_48 {dimension_numbers = #tpu.dot_dimension_numbers<[1], [0], [0], [1], [0, 0, 1, 1], [], []>} : vector<1x64xf32>, vector<64x128xf32>, vector<1x128xf32> -> vector<1x128xf32>
    %220 = arith.addf %219, %2 : vector<1x128xf32>
    %221 = arith.negf %220 : vector<1x128xf32>
    %222 = math.exp %221 : vector<1x128xf32>
    %cst_49 = arith.constant 1.000000e+00 : f32
    %223 = vector.broadcast %cst_49 : f32 to vector<1x128xf32>
    %224 = arith.addf %223, %222 : vector<1x128xf32>
    %225 = arith.divf %223, %224 : vector<1x128xf32>
    %226 = math.tanh %220 : vector<1x128xf32>
    %227 = vector.extract_strided_slice %225 {offsets = [0, 0], sizes = [1, 32], strides = [1, 1]} : vector<1x128xf32> to vector<1x32xf32>
    %228 = vector.extract_strided_slice %225 {offsets = [0, 32], sizes = [1, 32], strides = [1, 1]} : vector<1x128xf32> to vector<1x32xf32>
    %229 = vector.extract_strided_slice %226 {offsets = [0, 64], sizes = [1, 32], strides = [1, 1]} : vector<1x128xf32> to vector<1x32xf32>
    %230 = vector.extract_strided_slice %225 {offsets = [0, 96], sizes = [1, 32], strides = [1, 1]} : vector<1x128xf32> to vector<1x32xf32>
    %231 = arith.mulf %228, %196 : vector<1x32xf32>
    %232 = arith.mulf %227, %229 : vector<1x32xf32>
    %233 = arith.addf %231, %232 : vector<1x32xf32>
    %234 = math.tanh %233 : vector<1x32xf32>
    %235 = arith.mulf %230, %234 : vector<1x32xf32>
    %c6_i32 = arith.constant 6 : i32
    %236 = arith.index_cast %c6_i32 : i32 to index
    %c0_50 = arith.constant 0 : index
    %237 = vector.load %arg14[%236, %c0_50] : memref<8x128xf32, #tpu.memory_space<vmem>>, vector<1x128xf32>
    %cst_51 = arith.constant dense<0.000000e+00> : vector<1x128xf32>
    %238 = tpu.matmul %217, %0, %cst_51 {dimension_numbers = #tpu.dot_dimension_numbers<[1], [0], [0], [1], [0, 0, 1, 1], [], []>} : vector<1x32xf32>, vector<32x128xf32>, vector<1x128xf32> -> vector<1x128xf32>
    %239 = arith.addf %237, %238 : vector<1x128xf32>
    %240 = arith.negf %239 : vector<1x128xf32>
    %241 = math.exp %240 : vector<1x128xf32>
    %cst_52 = arith.constant 1.000000e+00 : f32
    %242 = vector.broadcast %cst_52 : f32 to vector<1x128xf32>
    %243 = arith.addf %242, %241 : vector<1x128xf32>
    %244 = arith.divf %242, %243 : vector<1x128xf32>
    %245 = math.tanh %239 : vector<1x128xf32>
    %246 = vector.extract_strided_slice %244 {offsets = [0, 0], sizes = [1, 32], strides = [1, 1]} : vector<1x128xf32> to vector<1x32xf32>
    %247 = vector.extract_strided_slice %244 {offsets = [0, 32], sizes = [1, 32], strides = [1, 1]} : vector<1x128xf32> to vector<1x32xf32>
    %248 = vector.extract_strided_slice %245 {offsets = [0, 64], sizes = [1, 32], strides = [1, 1]} : vector<1x128xf32> to vector<1x32xf32>
    %249 = vector.extract_strided_slice %244 {offsets = [0, 96], sizes = [1, 32], strides = [1, 1]} : vector<1x128xf32> to vector<1x32xf32>
    %250 = arith.mulf %247, %215 : vector<1x32xf32>
    %251 = arith.mulf %246, %248 : vector<1x32xf32>
    %252 = arith.addf %250, %251 : vector<1x32xf32>
    %253 = math.tanh %252 : vector<1x32xf32>
    %254 = arith.mulf %249, %253 : vector<1x32xf32>
    %255 = tpu.concatenate %254, %235 in 1 : vector<1x32xf32>, vector<1x32xf32> -> vector<1x64xf32>
    %cst_53 = arith.constant dense<0.000000e+00> : vector<1x128xf32>
    %256 = tpu.matmul %255, %1, %cst_53 {dimension_numbers = #tpu.dot_dimension_numbers<[1], [0], [0], [1], [0, 0, 1, 1], [], []>} : vector<1x64xf32>, vector<64x128xf32>, vector<1x128xf32> -> vector<1x128xf32>
    %257 = arith.addf %256, %2 : vector<1x128xf32>
    %258 = arith.negf %257 : vector<1x128xf32>
    %259 = math.exp %258 : vector<1x128xf32>
    %cst_54 = arith.constant 1.000000e+00 : f32
    %260 = vector.broadcast %cst_54 : f32 to vector<1x128xf32>
    %261 = arith.addf %260, %259 : vector<1x128xf32>
    %262 = arith.divf %260, %261 : vector<1x128xf32>
    %263 = math.tanh %257 : vector<1x128xf32>
    %264 = vector.extract_strided_slice %262 {offsets = [0, 0], sizes = [1, 32], strides = [1, 1]} : vector<1x128xf32> to vector<1x32xf32>
    %265 = vector.extract_strided_slice %262 {offsets = [0, 32], sizes = [1, 32], strides = [1, 1]} : vector<1x128xf32> to vector<1x32xf32>
    %266 = vector.extract_strided_slice %263 {offsets = [0, 64], sizes = [1, 32], strides = [1, 1]} : vector<1x128xf32> to vector<1x32xf32>
    %267 = vector.extract_strided_slice %262 {offsets = [0, 96], sizes = [1, 32], strides = [1, 1]} : vector<1x128xf32> to vector<1x32xf32>
    %268 = arith.mulf %265, %233 : vector<1x32xf32>
    %269 = arith.mulf %264, %266 : vector<1x32xf32>
    %270 = arith.addf %268, %269 : vector<1x32xf32>
    %271 = math.tanh %270 : vector<1x32xf32>
    %272 = arith.mulf %267, %271 : vector<1x32xf32>
    %c7_i32 = arith.constant 7 : i32
    %273 = arith.index_cast %c7_i32 : i32 to index
    %c0_55 = arith.constant 0 : index
    %274 = vector.load %arg14[%273, %c0_55] : memref<8x128xf32, #tpu.memory_space<vmem>>, vector<1x128xf32>
    %cst_56 = arith.constant dense<0.000000e+00> : vector<1x128xf32>
    %275 = tpu.matmul %254, %0, %cst_56 {dimension_numbers = #tpu.dot_dimension_numbers<[1], [0], [0], [1], [0, 0, 1, 1], [], []>} : vector<1x32xf32>, vector<32x128xf32>, vector<1x128xf32> -> vector<1x128xf32>
    %276 = arith.addf %274, %275 : vector<1x128xf32>
    %277 = arith.negf %276 : vector<1x128xf32>
    %278 = math.exp %277 : vector<1x128xf32>
    %cst_57 = arith.constant 1.000000e+00 : f32
    %279 = vector.broadcast %cst_57 : f32 to vector<1x128xf32>
    %280 = arith.addf %279, %278 : vector<1x128xf32>
    %281 = arith.divf %279, %280 : vector<1x128xf32>
    %282 = math.tanh %276 : vector<1x128xf32>
    %283 = vector.extract_strided_slice %281 {offsets = [0, 0], sizes = [1, 32], strides = [1, 1]} : vector<1x128xf32> to vector<1x32xf32>
    %284 = vector.extract_strided_slice %281 {offsets = [0, 32], sizes = [1, 32], strides = [1, 1]} : vector<1x128xf32> to vector<1x32xf32>
    %285 = vector.extract_strided_slice %282 {offsets = [0, 64], sizes = [1, 32], strides = [1, 1]} : vector<1x128xf32> to vector<1x32xf32>
    %286 = vector.extract_strided_slice %281 {offsets = [0, 96], sizes = [1, 32], strides = [1, 1]} : vector<1x128xf32> to vector<1x32xf32>
    %287 = arith.mulf %284, %252 : vector<1x32xf32>
    %288 = arith.mulf %283, %285 : vector<1x32xf32>
    %289 = arith.addf %287, %288 : vector<1x32xf32>
    %290 = math.tanh %289 : vector<1x32xf32>
    %291 = arith.mulf %286, %290 : vector<1x32xf32>
    %292 = tpu.concatenate %291, %272 in 1 : vector<1x32xf32>, vector<1x32xf32> -> vector<1x64xf32>
    %cst_58 = arith.constant dense<0.000000e+00> : vector<1x128xf32>
    %293 = tpu.matmul %292, %1, %cst_58 {dimension_numbers = #tpu.dot_dimension_numbers<[1], [0], [0], [1], [0, 0, 1, 1], [], []>} : vector<1x64xf32>, vector<64x128xf32>, vector<1x128xf32> -> vector<1x128xf32>
    %294 = arith.addf %293, %2 : vector<1x128xf32>
    %295 = arith.negf %294 : vector<1x128xf32>
    %296 = math.exp %295 : vector<1x128xf32>
    %cst_59 = arith.constant 1.000000e+00 : f32
    %297 = vector.broadcast %cst_59 : f32 to vector<1x128xf32>
    %298 = arith.addf %297, %296 : vector<1x128xf32>
    %299 = arith.divf %297, %298 : vector<1x128xf32>
    %300 = math.tanh %294 : vector<1x128xf32>
    %301 = vector.extract_strided_slice %299 {offsets = [0, 0], sizes = [1, 32], strides = [1, 1]} : vector<1x128xf32> to vector<1x32xf32>
    %302 = vector.extract_strided_slice %299 {offsets = [0, 32], sizes = [1, 32], strides = [1, 1]} : vector<1x128xf32> to vector<1x32xf32>
    %303 = vector.extract_strided_slice %300 {offsets = [0, 64], sizes = [1, 32], strides = [1, 1]} : vector<1x128xf32> to vector<1x32xf32>
    %304 = vector.extract_strided_slice %299 {offsets = [0, 96], sizes = [1, 32], strides = [1, 1]} : vector<1x128xf32> to vector<1x32xf32>
    %305 = arith.mulf %302, %270 : vector<1x32xf32>
    %306 = arith.mulf %301, %303 : vector<1x32xf32>
    %307 = arith.addf %305, %306 : vector<1x32xf32>
    %308 = math.tanh %307 : vector<1x32xf32>
    %309 = arith.mulf %304, %308 : vector<1x32xf32>
    %c8_i32 = arith.constant 8 : i32
    %c0_60 = arith.constant 0 : index
    %c0_61 = arith.constant 0 : index
    %310 = vector.load %arg7[%c0_60, %c0_61] : memref<32x8xf32, #tpu.memory_space<vmem>>, vector<32x8xf32>
    %cst_62 = arith.constant dense<0.000000e+00> : vector<1x8xf32>
    %311 = tpu.matmul %309, %310, %cst_62 {dimension_numbers = #tpu.dot_dimension_numbers<[1], [0], [0], [1], [0, 0, 1, 1], [], []>} : vector<1x32xf32>, vector<32x8xf32>, vector<1x8xf32> -> vector<1x8xf32>
    %c0_63 = arith.constant 0 : index
    %c0_64 = arith.constant 0 : index
    %312 = vector.load %arg8[%c0_63, %c0_64] : memref<1x8xf32, #tpu.memory_space<vmem>>, vector<1x8xf32>
    %313 = arith.addf %311, %312 : vector<1x8xf32>
    %314 = arith.negf %313 : vector<1x8xf32>
    %315 = math.exp %314 : vector<1x8xf32>
    %cst_65 = arith.constant 1.000000e+00 : f32
    %316 = vector.broadcast %cst_65 : f32 to vector<1x8xf32>
    %317 = arith.addf %316, %315 : vector<1x8xf32>
    %318 = arith.divf %316, %317 : vector<1x8xf32>
    %c0_66 = arith.constant 0 : index
    %c0_67 = arith.constant 0 : index
    %319 = vector.load %arg11[%c0_66, %c0_67] : memref<1x8xf32, #tpu.memory_space<vmem>>, vector<1x8xf32>
    tpu.vector_store %arg11[%c0_66, %c0_67], %318 {strides = array<i32>} : memref<1x8xf32, #tpu.memory_space<vmem>>, vector<1x8xf32>,
    %c0_68 = arith.constant 0 : index
    %c0_69 = arith.constant 0 : index
    %320 = vector.load %arg12[%c0_68, %c0_69] : memref<2x32xf32, #tpu.memory_space<vmem>>, vector<1x32xf32>
    tpu.vector_store %arg12[%c0_68, %c0_69], %291 {strides = array<i32>} : memref<2x32xf32, #tpu.memory_space<vmem>>, vector<1x32xf32>,
    %c1_70 = arith.constant 1 : index
    %c0_71 = arith.constant 0 : index
    %321 = vector.load %arg12[%c1_70, %c0_71] : memref<2x32xf32, #tpu.memory_space<vmem>>, vector<1x32xf32>
    tpu.vector_store %arg12[%c1_70, %c0_71], %309 {strides = array<i32>} : memref<2x32xf32, #tpu.memory_space<vmem>>, vector<1x32xf32>,
    %c0_72 = arith.constant 0 : index
    %c0_73 = arith.constant 0 : index
    %322 = vector.load %arg13[%c0_72, %c0_73] : memref<2x32xf32, #tpu.memory_space<vmem>>, vector<1x32xf32>
    tpu.vector_store %arg13[%c0_72, %c0_73], %289 {strides = array<i32>} : memref<2x32xf32, #tpu.memory_space<vmem>>, vector<1x32xf32>,
    %c1_74 = arith.constant 1 : index
    %c0_75 = arith.constant 0 : index
    %323 = vector.load %arg13[%c1_74, %c0_75] : memref<2x32xf32, #tpu.memory_space<vmem>>, vector<1x32xf32>
    tpu.vector_store %arg13[%c1_74, %c0_75], %307 {strides = array<i32>} : memref<2x32xf32, #tpu.memory_space<vmem>>, vector<1x32xf32>,
    return
  }
  func.func @transform_0(%arg0: i32) -> (i32, i32) {
    %c0_i32 = arith.constant 0 : i32
    %c0_i32_0 = arith.constant 0 : i32
    %c0_i32_1 = arith.constant 0 : i32
    return %c0_i32, %c0_i32_0 : i32, i32
  }
  func.func @transform_1(%arg0: i32) -> (i32, i32) {
    %c0_i32 = arith.constant 0 : i32
    %c0_i32_0 = arith.constant 0 : i32
    %c0_i32_1 = arith.constant 0 : i32
    return %c0_i32, %c0_i32_0 : i32, i32
  }
  func.func @transform_2(%arg0: i32) -> (i32, i32) {
    %c0_i32 = arith.constant 0 : i32
    %c0_i32_0 = arith.constant 0 : i32
    %c0_i32_1 = arith.constant 0 : i32
    return %c0_i32, %c0_i32_0 : i32, i32
  }
  func.func @transform_3(%arg0: i32) -> (i32, i32) {
    %c0_i32 = arith.constant 0 : i32
    %c0_i32_0 = arith.constant 0 : i32
    %c0_i32_1 = arith.constant 0 : i32
    return %c0_i32, %c0_i32_0 : i32, i32
  }
  func.func @transform_4(%arg0: i32) -> (i32, i32) {
    %c0_i32 = arith.constant 0 : i32
    %c0_i32_0 = arith.constant 0 : i32
    %c0_i32_1 = arith.constant 0 : i32
    return %c0_i32, %c0_i32_0 : i32, i32
  }
  func.func @transform_5(%arg0: i32) -> (i32, i32) {
    %c0_i32 = arith.constant 0 : i32
    %c0_i32_0 = arith.constant 0 : i32
    %c0_i32_1 = arith.constant 0 : i32
    return %c0_i32, %c0_i32_0 : i32, i32
  }
  func.func @transform_6(%arg0: i32) -> (i32, i32) {
    %c0_i32 = arith.constant 0 : i32
    %c0_i32_0 = arith.constant 0 : i32
    %c0_i32_1 = arith.constant 0 : i32
    return %c0_i32, %c0_i32_0 : i32, i32
  }
  func.func @transform_7(%arg0: i32) -> (i32, i32) {
    %c0_i32 = arith.constant 0 : i32
    %c0_i32_0 = arith.constant 0 : i32
    %c0_i32_1 = arith.constant 0 : i32
    return %c0_i32, %c0_i32_0 : i32, i32
  }
  func.func @transform_8(%arg0: i32) -> (i32, i32) {
    %c0_i32 = arith.constant 0 : i32
    %c0_i32_0 = arith.constant 0 : i32
    %c0_i32_1 = arith.constant 0 : i32
    return %c0_i32, %c0_i32_0 : i32, i32
  }
  func.func @transform_9(%arg0: i32) -> (i32, i32) {
    %c0_i32 = arith.constant 0 : i32
    %c0_i32_0 = arith.constant 0 : i32
    %c0_i32_1 = arith.constant 0 : i32
    return %c0_i32, %c0_i32_0 : i32, i32
  }
  func.func @transform_10(%arg0: i32) -> (i32, i32) {
    %c0_i32 = arith.constant 0 : i32
    %c0_i32_0 = arith.constant 0 : i32
    %c0_i32_1 = arith.constant 0 : i32
    return %c0_i32, %c0_i32_0 : i32, i32
  }
  func.func @transform_11(%arg0: i32) -> (i32, i32) {
    %c0_i32 = arith.constant 0 : i32
    %c0_i32_0 = arith.constant 0 : i32
    %c0_i32_1 = arith.constant 0 : i32
    return %c0_i32, %c0_i32_0 : i32, i32
  }
  func.func @transform_12(%arg0: i32) -> (i32, i32) {
    %c0_i32 = arith.constant 0 : i32
    %c0_i32_0 = arith.constant 0 : i32
    %c0_i32_1 = arith.constant 0 : i32
    return %c0_i32, %c0_i32_0 : i32, i32
  }
}

</mosaic_0001>

<bundles_post_ra>
// kernel: lstm_tagger_forward.1
= control target key start
LH: loop header
LB: loop body
LE: loop exit
PB: predicated region body
PF: predicated region fallthrough
CT: control target
= control target key end

     0   :  { %18 = vsyncpa [#allocation4], 0  ;;  %v2527_v1 = vmov 0.0   ;;  %vm2528_vm0 = vmmov 0   ;;  %vm63_vm1 = vcmask 130048   ;;  %s3124_s0 = inlined_call_operand.vmem [shape: f32[8,16], index: 0, kind: input, shape index: {}]   ;;  %s3125_s1 = inlined_call_operand.vmem [shape: f32[16,128], index: 1, kind: input, shape index: {}]   ;;  %s3126_s2 = inlined_call_operand.vmem [shape: f32[1,128], index: 2, kind: input, shape index: {}]   ;;  %s3127_s3 = inlined_call_operand.vmem [shape: f32[32,128], index: 3, kind: input, shape index: {}]   ;;  %s3128_s4 = inlined_call_operand.vmem [shape: f32[64,128], index: 4, kind: input, shape index: {}]   ;;  %s3129_s5 = inlined_call_operand.vmem [shape: f32[1,128], index: 5, kind: input, shape index: {}]   ;;  %s3130_s6 = inlined_call_operand.vmem [shape: f32[32,8], index: 6, kind: input, shape index: {}]   ;;  %s3131_s7 = inlined_call_operand.vmem [shape: f32[1,8], index: 7, kind: input, shape index: {}]   ;;  %s3132_s8 = inlined_call_operand.vmem [shape: f32[2,32], index: 8, kind: input, shape index: {}]   ;;  %s3133_s9 = inlined_call_operand.vmem [shape: f32[2,32], index: 9, kind: input, shape index: {}]   ;;  %s3134_s10 = inlined_call_operand.vmem [shape: f32[1,8], index: 10, kind: output, shape index: {0}]   ;;  %s3135_s11 = inlined_call_operand.hbm [shape: f32[2,32], index: 11, kind: output, shape index: {1}]   ;;  %s3136_s12 = inlined_call_operand.hbm [shape: f32[2,32], index: 12, kind: output, shape index: {2}]  }
   0x1   :  { %v55_v0 = vld [vmem:[%s3125_s1 + $0x8] sm:$0xff]  ;;  %2075 = vmatprep.subr.mxu0 %v2527_v1  ;;  %v54_v2 = vld [vmem:[%s3125_s1] sm:$0xff]  ;;  %2079 = vmatprep.mubr.msk.f32.mxu0 %vm2528_vm0, %v2527_v1  ;;  %v2611_v3 = vld [vmem:[%s3127_s3 + $0x18] sm:$0xff] }
   0x2   :  { %2076 = vmatpush3.msra.mxu0 %v55_v0  ;;  %v53_v4 = vld [vmem:[%s3124_s0] sm:$0xff]  ;;  %2082 = vmatprep.subr.mxu1 %v2527_v1  ;;  %v2620_v5 = vld [vmem:[%s3127_s3 + $0x10] sm:$0xff] }
   0x3   :  { %2077 = vmatprep.subr.mxu0 %v2527_v1  ;;  %2083 = vmatpush3.msra.mxu1 %v2611_v3 }
   0x4   :  { %19 = vsyncpa [#allocation6], 0  ;;  %2078 = vmatpush3.msra.mxu0 %v54_v2  ;;  %2084 = vmatprep.subr.mxu1 %v2527_v1  ;;  %v2628_v6 = vld [vmem:[%s3127_s3 + $0x8] sm:$0xff]  ;;  %v2635_v7 = vld [vmem:[%s3127_s3] sm:$0xff]  ;;  %vm143_vm2 = vcmask 261120   ;;  %s2529_s19 = smov 64  }
   0x5   :  { %2080 = vmatmul.mubr.msk.f32.vlgmr.msra.gmra.mxu0 %vm63_vm1, %v53_v4  ;;  %2085 = vmatpush3.msra.mxu1 %v2620_v5  ;;  %v138_v8 = vld [vmem:[%s3132_s8] sm:$0x1]  ;;  %s2530_s22 = smov 32   ;;  %v2675_v29 = vld [vmem:[%s3128_s4 + $0x38] sm:$0xff]  ;;  %v2680_v30 = vld [vmem:[%s3128_s4 + $0x30] sm:$0xff]  ;;  %vm255_vm3 = vcmask 523264  }
   0x6   :  { %2086 = vmatprep.subr.mxu1 %v2527_v1  ;;  %2090 = vmatprep.mubr.msk.f32.mxu1 %vm2528_vm0, %v2527_v1  ;;  %v1919_v9 = vld [vmem:[%s3126_s2] ss:$0 sm:$0xff]  ;;  %v2687_v31 = vld [vmem:[%s3128_s4 + $0x28] sm:$0xff]  ;;  %v2701_v33 = vld [vmem:[%s3128_s4 + $0x18] sm:$0xff]  ;;  %vm1873_vm4 = vcmask 253952   ;;  %s2531_s28 = smov 96  }
   0x7   :  { %2087 = vmatpush3.msra.mxu1 %v2628_v6  ;;  %2093 = vmatprep.subr.mxu0 %v2527_v1  ;;  %v139_v18 = vld [vmem:[%s3133_s9] sm:$0x1]  ;;  %v2708_v34 = vld [vmem:[%s3128_s4 + $0x10] sm:$0xff]  ;;  %v2715_v36 = vld [vmem:[%s3128_s4 + $0x8] sm:$0xff]  ;;  %s2533_s29 = smov [#allocation5]  }
   0x8   :  { %2088 = vmatprep.subr.mxu1 %v2527_v1  ;;  %2109 = vmatprep.mubr.msk.f32.mxu0 %vm2528_vm0, %v2527_v1  ;;  %v2694_v32 = vld [vmem:[%s3128_s4 + $0x20] sm:$0xff]  ;;  %s1905_s30 = sshll.u32 %s2533_s29, 4  ;;  %s1906_s30 = int_to_ptr.vmem [resolvable:$true] %s1905_s30 }
   0x9   :  { %2089 = vmatpush3.msra.mxu1 %v2635_v7  ;;  %2094 = vmatpush3.msra.mxu0 %v2675_v29  ;;  %v140_v37 = vld [vmem:[%s3132_s8 + $0x1] sm:$0x1]  ;;  %v2768_v44 = vld [vmem:[%s3129_s5] sm:$0x1] }
   0xa   :  { %2091 = vmatmul.mubr.msk.f32.vlgmr.msra.gmra.mxu1 %vm143_vm2, %v138_v8  ;;  %2112 = vmatprep.subr.mxu1 %v2527_v1  ;;  %v2729_v38 = vld [vmem:[%s3128_s4] sm:$0xff] }
   0xb   :  { %2113 = vmatpush3.msra.mxu1 %v2611_v3  ;;  %2120 = vmatprep.mubr.msk.f32.mxu1 %vm2528_vm0, %v2527_v1  ;;  %v141_v54 = vld [vmem:[%s3133_s9 + $0x1] sm:$0x1] }
   0xc   :  { %2114 = vmatprep.subr.mxu1 %v2527_v1  ;;  %2095 = vmatprep.subr.mxu0 %v2527_v1 }
   0xd   :  { %2115 = vmatpush3.msra.mxu1 %v2620_v5  ;;  %2096 = vmatpush3.msra.mxu0 %v2680_v30 }
   0xe   :  { %2116 = vmatprep.subr.mxu1 %v2527_v1  ;;  %2097 = vmatprep.subr.mxu0 %v2527_v1 }
   0xf   :  { %2117 = vmatpush3.msra.mxu1 %v2628_v6  ;;  %2098 = vmatpush3.msra.mxu0 %v2687_v31 }
  0x10   :  { %2118 = vmatprep.subr.mxu1 %v2527_v1  ;;  %2099 = vmatprep.subr.mxu0 %v2527_v1 }
  0x11   :  { %2119 = vmatpush3.msra.mxu1 %v2635_v7  ;;  %2100 = vmatpush3.msra.mxu0 %v2694_v32 }
  0x12   :  { %2123 = vmatprep.subr.mxu1 %v2527_v1  ;;  %2101 = vmatprep.subr.mxu0 %v2527_v1 }
  0x13   :  { %2102 = vmatpush3.msra.mxu0 %v2701_v33 }
  0x14   :  { %2103 = vmatprep.subr.mxu0 %v2527_v1 }
  0x15   :  { %2104 = vmatpush3.msra.mxu0 %v2708_v34 }
  0x16   :  { %2105 = vmatprep.subr.mxu0 %v2527_v1 }
  0x17   :  { %2106 = vmatpush3.msra.mxu0 %v2715_v36 }
  0x18   :  { %2107 = vmatprep.subr.mxu0 %v2527_v1 }
  0x19   :  { %2108 = vmatpush3.msra.mxu0 %v2729_v38 }
  0x1a   :  { %2142 = vmatprep.subr.mxu0 %v2527_v1 }
  0xc5   :  { %v133_v10 = vpop.f32.mrf.mxu0 }
  0xc6   :  { %v134_v11 = vadd.f32 %v1919_v9, %v133_v10 }
  0xc7   :  { %v2081_v12 = vpop.f32.mrf.mxu0 }
  0xc8   :  { %137 = vst [vmem:[#allocation2] sm:$0xff] %v134_v11 }
  0xca   :  { %v213_v13 = vpop.f32.mrf.mxu1 }
  0xcc   :  { %v2092_v14 = vpop.f32.mrf.mxu1 }
  0xcf   :  { %v142_v15 = vld [vmem:[#allocation2] sm:$0x1]  ;;  %v357_v45 = vld [vmem:[#allocation2 + $0x1] sm:$0x1] }
  0xd0   :  { %v217_v16 = vadd.f32 %v213_v13, %v142_v15 }
  0xd2   :  { %2340 = vtanh.f32 %v217_v16  ;;  %v1922_v19 = vmul.f32 -1.442695, %v217_v16 }
  0xd4   :  { %2342 = vpow2.f32 %v1922_v19 }
  0xdf   :  { %v2341_v17 = vpop.eup %2340 }
  0xe0   :  { %231 = vrot.lane.b32.xlu0 %v2341_v17, %s2529_s19 }
  0xe1   :  { %v2343_v20 = vpop.eup %2342 }
  0xe2   :  { %v221_v21 = vadd.f32 1.0, %v2343_v20 }
  0xe4   :  { %226 = vrot.lane.b32.xlu0 %v139_v18, %s2530_s22  ;;  %2344 = vrcp.f32 %v221_v21 }
  0xf1   :  { %v2345_v22 = vpop.eup %2344 }
 0x152   :  { %v232_v23 = vpop.permute.xlu0 %231 }
 0x153   :  { %v234_v24 = vmul.f32 %v2345_v22, %v232_v23 }
 0x155   :  { %236 = vrot.lane.b32.xlu1 %v234_v24, %s2530_s22  ;;  %v561_v24 = vld [vmem:[#allocation2 + $0x2] sm:$0x1] }
 0x156   :  { %v227_v25 = vpop.permute.xlu0 %226 }
 0x157   :  { %v229_v26 = vmul.f32 %v2345_v22, %v227_v25 }
 0x1c7   :  { %v237_v27 = vpop.permute.xlu1 %236 }
 0x1c8   :  { %v2669_v28 = vadd.f32 %v237_v27, %v229_v26 }
 0x1ca   :  { %2346 = vtanh.f32 %v2669_v28 }
 0x1d7   :  { %v2347_v35 = vpop.eup %2346 }
 0x1d8   :  { %242 = vrot.lane.b32.xlu1 %v2347_v35, %s2529_s19 }
 0x1dc   :  { %251 = vrot.lane.b32.xlu1 %v140_v37, %s2530_s22 }
 0x24a   :  { %v243_v39 = vpop.permute.xlu1 %242 }
 0x24b   :  { %v245_v40 = vmul.f32 %v2345_v22, %v243_v39 }
 0x24d   :  { %247 = vrot.lane.b32.xlu0 %v245_v40, %s2530_s22 }
 0x24e   :  { %v252_v41 = vpop.permute.xlu1 %251 }
 0x2bf   :  { %v248_v42 = vpop.permute.xlu0 %247 }
 0x2c0   :  { %v254_v43 = vsel %vm143_vm2, %v248_v42, %v252_v41  ;;  %2121 = vmatmul.mubr.msk.f32.vlgmr.msra.gmra.mxu1 %vm143_vm2, %v248_v42 }
 0x2c1   :  { %2110 = vmatmul.mubr.msk.f32.vlgmr.msra.gmra.mxu0 %vm255_vm3, %v254_v43  ;;  %2124 = vmatpush3.msra.mxu1 %v2675_v29 }
 0x2c2   :  { %2125 = vmatprep.subr.mxu1 %v2527_v1  ;;  %2143 = vmatpush3.msra.mxu0 %v2611_v3 }
 0x2c3   :  { %2126 = vmatpush3.msra.mxu1 %v2680_v30  ;;  %2144 = vmatprep.subr.mxu0 %v2527_v1 }
 0x2c4   :  { %2127 = vmatprep.subr.mxu1 %v2527_v1  ;;  %2145 = vmatpush3.msra.mxu0 %v2620_v5 }
 0x2c5   :  { %2128 = vmatpush3.msra.mxu1 %v2687_v31  ;;  %2146 = vmatprep.subr.mxu0 %v2527_v1 }
 0x2c6   :  { %2129 = vmatprep.subr.mxu1 %v2527_v1  ;;  %2147 = vmatpush3.msra.mxu0 %v2628_v6 }
 0x2c7   :  { %2130 = vmatpush3.msra.mxu1 %v2694_v32  ;;  %2148 = vmatprep.subr.mxu0 %v2527_v1 }
 0x2c8   :  { %2131 = vmatprep.subr.mxu1 %v2527_v1  ;;  %2149 = vmatpush3.msra.mxu0 %v2635_v7 }
 0x2c9   :  { %2132 = vmatpush3.msra.mxu1 %v2701_v33  ;;  %2150 = vmatprep.mubr.msk.f32.mxu0 %vm2528_vm0, %v2527_v1 }
 0x2ca   :  { %2133 = vmatprep.subr.mxu1 %v2527_v1  ;;  %2139 = vmatprep.mubr.msk.f32.mxu1 %vm2528_vm0, %v2527_v1 }
 0x2cb   :  { %2134 = vmatpush3.msra.mxu1 %v2708_v34  ;;  %2153 = vmatprep.subr.mxu0 %v2527_v1 }
 0x2cc   :  { %2135 = vmatprep.subr.mxu1 %v2527_v1 }
 0x2cd   :  { %2136 = vmatpush3.msra.mxu1 %v2715_v36 }
 0x2ce   :  { %2137 = vmatprep.subr.mxu1 %v2527_v1 }
 0x2cf   :  { %2138 = vmatpush3.msra.mxu1 %v2729_v38 }
 0x2d0   :  { %2172 = vmatprep.subr.mxu1 %v2527_v1 }
 0x380   :  { %v426_v46 = vpop.f32.mrf.mxu1 }
 0x381   :  { %v430_v47 = vadd.f32 %v426_v46, %v357_v45  ;;  %v325_v48 = vpop.f32.mrf.mxu0 }
 0x382   :  { %v326_v49 = vadd.f32 %v325_v48, %v2768_v44  ;;  %v2122_v50 = vpop.f32.mrf.mxu1 }
 0x383   :  { %2348 = vtanh.f32 %v430_v47  ;;  %v2111_v51 = vpop.f32.mrf.mxu0  ;;  %v1926_v55 = vmul.f32 -1.442695, %v430_v47 }
 0x384   :  { %2350 = vtanh.f32 %v326_v49  ;;  %v1924_v56 = vmul.f32 -1.442695, %v326_v49 }
 0x385   :  { %2352 = vpow2.f32 %v1926_v55 }
 0x386   :  { %2354 = vpow2.f32 %v1924_v56 }
 0x390   :  { %v2349_v52 = vpop.eup %2348 }
 0x391   :  { %v2351_v53 = vpop.eup %2350  ;;  %440 = vrot.lane.b32.xlu1 %v2349_v52, %s2529_s19 }
 0x392   :  { %342 = vrot.lane.b32.xlu0 %v2351_v53, %s2529_s19  ;;  %v2353_v57 = vpop.eup %2352 }
 0x393   :  { %v2355_v58 = vpop.eup %2354  ;;  %v434_v59 = vadd.f32 1.0, %v2353_v57 }
 0x394   :  { %v332_v60 = vadd.f32 1.0, %v2355_v58 }
 0x395   :  { %2356 = vrcp.f32 %v434_v59 }
 0x396   :  { %337 = vrot.lane.b32.xlu0 %v141_v54, %s2530_s22  ;;  %2358 = vrcp.f32 %v332_v60 }
 0x3a2   :  { %v2357_v61 = vpop.eup %2356 }
 0x3a3   :  { %v2359_v63 = vpop.eup %2358  ;;  %v438_v9 = vmul.f32 %v2357_v61, %v2669_v28 }
 0x403   :  { %v441_v62 = vpop.permute.xlu1 %440 }
 0x404   :  { %v443_v0 = vmul.f32 %v2357_v61, %v441_v62  ;;  %v343_v2 = vpop.permute.xlu0 %342 }
 0x405   :  { %v345_v4 = vmul.f32 %v2359_v63, %v343_v2 }
 0x406   :  { %445 = vrot.lane.b32.xlu0 %v443_v0, %s2530_s22 }
 0x407   :  { %347 = vrot.lane.b32.xlu1 %v345_v4, %s2530_s22 }
 0x408   :  { %v338_v8 = vpop.permute.xlu0 %337 }
 0x409   :  { %v340_v10 = vmul.f32 %v2359_v63, %v338_v8 }
 0x478   :  { %v446_v11 = vpop.permute.xlu0 %445 }
 0x479   :  { %v2780_v12 = vadd.f32 %v446_v11, %v438_v9  ;;  %v348_v13 = vpop.permute.xlu1 %347 }
 0x47a   :  { %v2782_v14 = vadd.f32 %v348_v13, %v340_v10  ;;  %v765_v10 = vld [vmem:[#allocation2 + $0x3] sm:$0x1] }
 0x47b   :  { %2360 = vtanh.f32 %v2780_v12 }
 0x47c   :  { %2362 = vtanh.f32 %v2782_v14 }
 0x488   :  { %v2361_v15 = vpop.eup %2360 }
 0x489   :  { %v2363_v16 = vpop.eup %2362  ;;  %451 = vrot.lane.b32.xlu0 %v2361_v15, %s2529_s19 }
 0x48a   :  { %353 = vrot.lane.b32.xlu1 %v2363_v16, %s2529_s19 }
 0x4fb   :  { %v452_v17 = vpop.permute.xlu0 %451 }
 0x4fc   :  { %v454_v18 = vmul.f32 %v2357_v61, %v452_v17  ;;  %v354_v19 = vpop.permute.xlu1 %353 }
 0x4fd   :  { %v356_v20 = vmul.f32 %v2359_v63, %v354_v19 }
 0x4fe   :  { %456 = vrot.lane.b32.xlu1 %v454_v18, %s2530_s22 }
 0x4ff   :  { %460 = vrot.lane.b32.xlu0 %v356_v20, %s2529_s19 }
 0x570   :  { %v457_v21 = vpop.permute.xlu1 %456 }
 0x571   :  { %2151 = vmatmul.mubr.msk.f32.vlgmr.msra.gmra.mxu0 %vm143_vm2, %v457_v21  ;;  %v461_v22 = vpop.permute.xlu0 %460 }
 0x572   :  { %v463_v23 = vsel %vm143_vm2, %v457_v21, %v461_v22  ;;  %2154 = vmatpush3.msra.mxu0 %v2675_v29  ;;  %2169 = vmatprep.mubr.msk.f32.mxu0 %vm2528_vm0, %v2527_v1 }
 0x573   :  { %2140 = vmatmul.mubr.msk.f32.vlgmr.msra.gmra.mxu1 %vm255_vm3, %v463_v23  ;;  %2155 = vmatprep.subr.mxu0 %v2527_v1 }
 0x574   :  { %2156 = vmatpush3.msra.mxu0 %v2680_v30  ;;  %2173 = vmatpush3.msra.mxu1 %v2611_v3 }
 0x575   :  { %2157 = vmatprep.subr.mxu0 %v2527_v1  ;;  %2174 = vmatprep.subr.mxu1 %v2527_v1 }
 0x576   :  { %2158 = vmatpush3.msra.mxu0 %v2687_v31  ;;  %2175 = vmatpush3.msra.mxu1 %v2620_v5 }
 0x577   :  { %2159 = vmatprep.subr.mxu0 %v2527_v1  ;;  %2176 = vmatprep.subr.mxu1 %v2527_v1 }
 0x578   :  { %2160 = vmatpush3.msra.mxu0 %v2694_v32  ;;  %2177 = vmatpush3.msra.mxu1 %v2628_v6 }
 0x579   :  { %2161 = vmatprep.subr.mxu0 %v2527_v1  ;;  %2178 = vmatprep.subr.mxu1 %v2527_v1 }
 0x57a   :  { %2162 = vmatpush3.msra.mxu0 %v2701_v33  ;;  %2179 = vmatpush3.msra.mxu1 %v2635_v7 }
 0x57b   :  { %2163 = vmatprep.subr.mxu0 %v2527_v1  ;;  %2180 = vmatprep.mubr.msk.f32.mxu1 %vm2528_vm0, %v2527_v1 }
 0x57c   :  { %2164 = vmatpush3.msra.mxu0 %v2708_v34  ;;  %2183 = vmatprep.subr.mxu1 %v2527_v1 }
 0x57d   :  { %2165 = vmatprep.subr.mxu0 %v2527_v1 }
 0x57e   :  { %2166 = vmatpush3.msra.mxu0 %v2715_v36 }
 0x57f   :  { %2167 = vmatprep.subr.mxu0 %v2527_v1 }
 0x580   :  { %2168 = vmatpush3.msra.mxu0 %v2729_v38 }
 0x581   :  { %2202 = vmatprep.subr.mxu0 %v2527_v1 }
 0x631   :  { %v630_v25 = vpop.f32.mrf.mxu0 }
 0x632   :  { %v634_v26 = vadd.f32 %v630_v25, %v561_v24 }
 0x633   :  { %v533_v27 = vpop.f32.mrf.mxu1  ;;  %v2152_v28 = vpop.f32.mrf.mxu0 }
 0x634   :  { %2364 = vtanh.f32 %v634_v26  ;;  %v534_v35 = vadd.f32 %v533_v27, %v2768_v44  ;;  %v1930_v41 = vmul.f32 -1.442695, %v634_v26 }
 0x635   :  { %v2141_v37 = vpop.f32.mrf.mxu1 }
 0x636   :  { %2366 = vtanh.f32 %v534_v35  ;;  %v1928_v42 = vmul.f32 -1.442695, %v534_v35 }
 0x637   :  { %2368 = vpow2.f32 %v1930_v41 }
 0x638   :  { %2370 = vpow2.f32 %v1928_v42 }
 0x641   :  { %v2365_v39 = vpop.eup %2364 }
 0x642   :  { %644 = vrot.lane.b32.xlu0 %v2365_v39, %s2529_s19 }
 0x643   :  { %v2367_v40 = vpop.eup %2366 }
 0x644   :  { %546 = vrot.lane.b32.xlu1 %v2367_v40, %s2529_s19  ;;  %v2369_v43 = vpop.eup %2368 }
 0x645   :  { %v2371_v45 = vpop.eup %2370  ;;  %v638_v46 = vadd.f32 1.0, %v2369_v43 }
 0x646   :  { %v540_v47 = vadd.f32 1.0, %v2371_v45 }
 0x647   :  { %2372 = vrcp.f32 %v638_v46 }
 0x648   :  { %2374 = vrcp.f32 %v540_v47 }
 0x654   :  { %v2373_v48 = vpop.eup %2372 }
 0x655   :  { %v2375_v51 = vpop.eup %2374  ;;  %v642_v54 = vmul.f32 %v2373_v48, %v2780_v12 }
 0x656   :  { %v544_v57 = vmul.f32 %v2375_v51, %v2782_v14 }
 0x6b4   :  { %v645_v49 = vpop.permute.xlu0 %644 }
 0x6b5   :  { %v647_v50 = vmul.f32 %v2373_v48, %v645_v49 }
 0x6b6   :  { %v547_v52 = vpop.permute.xlu1 %546 }
 0x6b7   :  { %649 = vrot.lane.b32.xlu0 %v647_v50, %s2530_s22  ;;  %v549_v53 = vmul.f32 %v2375_v51, %v547_v52 }
 0x6b9   :  { %551 = vrot.lane.b32.xlu1 %v549_v53, %s2530_s22 }
 0x729   :  { %v650_v55 = vpop.permute.xlu0 %649 }
 0x72a   :  { %v2827_v56 = vadd.f32 %v650_v55, %v642_v54  ;;  %v969_v55 = vld [vmem:[#allocation2 + $0x4] sm:$0x1] }
 0x72b   :  { %v552_v58 = vpop.permute.xlu1 %551 }
 0x72c   :  { %2376 = vtanh.f32 %v2827_v56  ;;  %v2831_v59 = vadd.f32 %v552_v58, %v544_v57 }
 0x72e   :  { %2378 = vtanh.f32 %v2831_v59 }
 0x739   :  { %v2377_v60 = vpop.eup %2376 }
 0x73a   :  { %655 = vrot.lane.b32.xlu0 %v2377_v60, %s2529_s19 }
 0x73b   :  { %v2379_v61 = vpop.eup %2378 }
 0x73c   :  { %557 = vrot.lane.b32.xlu1 %v2379_v61, %s2529_s19 }
 0x7ac   :  { %v656_v62 = vpop.permute.xlu0 %655 }
 0x7ad   :  { %v658_v63 = vmul.f32 %v2373_v48, %v656_v62 }
 0x7ae   :  { %v558_v0 = vpop.permute.xlu1 %557 }
 0x7af   :  { %660 = vrot.lane.b32.xlu1 %v658_v63, %s2530_s22  ;;  %v560_v2 = vmul.f32 %v2375_v51, %v558_v0 }
 0x7b1   :  { %664 = vrot.lane.b32.xlu0 %v560_v2, %s2529_s19 }
 0x821   :  { %v661_v4 = vpop.permute.xlu1 %660 }
 0x822   :  { %2181 = vmatmul.mubr.msk.f32.vlgmr.msra.gmra.mxu1 %vm143_vm2, %v661_v4 }
 0x823   :  { %2184 = vmatpush3.msra.mxu1 %v2675_v29  ;;  %2199 = vmatprep.mubr.msk.f32.mxu1 %vm2528_vm0, %v2527_v1  ;;  %v665_v8 = vpop.permute.xlu0 %664 }
 0x824   :  { %2185 = vmatprep.subr.mxu1 %v2527_v1  ;;  %v667_v9 = vsel %vm143_vm2, %v661_v4, %v665_v8 }
 0x825   :  { %2186 = vmatpush3.msra.mxu1 %v2680_v30  ;;  %2170 = vmatmul.mubr.msk.f32.vlgmr.msra.gmra.mxu0 %vm255_vm3, %v667_v9 }
 0x826   :  { %2187 = vmatprep.subr.mxu1 %v2527_v1  ;;  %2203 = vmatpush3.msra.mxu0 %v2611_v3 }
 0x827   :  { %2188 = vmatpush3.msra.mxu1 %v2687_v31  ;;  %2204 = vmatprep.subr.mxu0 %v2527_v1 }
 0x828   :  { %2189 = vmatprep.subr.mxu1 %v2527_v1  ;;  %2205 = vmatpush3.msra.mxu0 %v2620_v5 }
 0x829   :  { %2190 = vmatpush3.msra.mxu1 %v2694_v32  ;;  %2206 = vmatprep.subr.mxu0 %v2527_v1 }
 0x82a   :  { %2191 = vmatprep.subr.mxu1 %v2527_v1  ;;  %2207 = vmatpush3.msra.mxu0 %v2628_v6 }
 0x82b   :  { %2192 = vmatpush3.msra.mxu1 %v2701_v33  ;;  %2208 = vmatprep.subr.mxu0 %v2527_v1 }
 0x82c   :  { %2193 = vmatprep.subr.mxu1 %v2527_v1  ;;  %2209 = vmatpush3.msra.mxu0 %v2635_v7 }
 0x82d   :  { %2194 = vmatpush3.msra.mxu1 %v2708_v34  ;;  %2210 = vmatprep.mubr.msk.f32.mxu0 %vm2528_vm0, %v2527_v1 }
 0x82e   :  { %2195 = vmatprep.subr.mxu1 %v2527_v1  ;;  %2213 = vmatprep.subr.mxu0 %v2527_v1 }
 0x82f   :  { %2196 = vmatpush3.msra.mxu1 %v2715_v36 }
 0x830   :  { %2197 = vmatprep.subr.mxu1 %v2527_v1 }
 0x831   :  { %2198 = vmatpush3.msra.mxu1 %v2729_v38 }
 0x832   :  { %2232 = vmatprep.subr.mxu1 %v2527_v1 }
 0x8e2   :  { %v834_v11 = vpop.f32.mrf.mxu1 }
 0x8e3   :  { %v838_v12 = vadd.f32 %v834_v11, %v765_v10 }
 0x8e4   :  { %v2182_v13 = vpop.f32.mrf.mxu1 }
 0x8e5   :  { %2380 = vtanh.f32 %v838_v12  ;;  %v737_v14 = vpop.f32.mrf.mxu0  ;;  %v1934_v19 = vmul.f32 -1.442695, %v838_v12 }
 0x8e6   :  { %v738_v15 = vadd.f32 %v737_v14, %v2768_v44 }
 0x8e7   :  { %v2171_v16 = vpop.f32.mrf.mxu0 }
 0x8e8   :  { %2382 = vtanh.f32 %v738_v15  ;;  %v1932_v20 = vmul.f32 -1.442695, %v738_v15 }
 0x8e9   :  { %2384 = vpow2.f32 %v1934_v19 }
 0x8ea   :  { %2386 = vpow2.f32 %v1932_v20 }
 0x8f2   :  { %v2381_v17 = vpop.eup %2380 }
 0x8f3   :  { %848 = vrot.lane.b32.xlu0 %v2381_v17, %s2529_s19 }
 0x8f5   :  { %v2383_v18 = vpop.eup %2382 }
 0x8f6   :  { %750 = vrot.lane.b32.xlu1 %v2383_v18, %s2529_s19  ;;  %v2385_v21 = vpop.eup %2384 }
 0x8f7   :  { %v842_v22 = vadd.f32 1.0, %v2385_v21  ;;  %v2387_v23 = vpop.eup %2386 }
 0x8f8   :  { %v744_v24 = vadd.f32 1.0, %v2387_v23 }
 0x8f9   :  { %2388 = vrcp.f32 %v842_v22 }
 0x8fa   :  { %2390 = vrcp.f32 %v744_v24 }
 0x906   :  { %v2389_v25 = vpop.eup %2388 }
 0x907   :  { %v2391_v28 = vpop.eup %2390  ;;  %v846_v39 = vmul.f32 %v2389_v25, %v2827_v56 }
 0x908   :  { %v748_v42 = vmul.f32 %v2391_v28, %v2831_v59 }
 0x965   :  { %v849_v26 = vpop.permute.xlu0 %848 }
 0x966   :  { %v851_v27 = vmul.f32 %v2389_v25, %v849_v26 }
 0x968   :  { %853 = vrot.lane.b32.xlu0 %v851_v27, %s2530_s22  ;;  %v751_v35 = vpop.permute.xlu1 %750 }
 0x969   :  { %v753_v37 = vmul.f32 %v2391_v28, %v751_v35 }
 0x96b   :  { %755 = vrot.lane.b32.xlu1 %v753_v37, %s2530_s22 }
 0x9da   :  { %v854_v40 = vpop.permute.xlu0 %853 }
 0x9db   :  { %v2875_v41 = vadd.f32 %v854_v40, %v846_v39 }
 0x9dd   :  { %2392 = vtanh.f32 %v2875_v41  ;;  %v756_v43 = vpop.permute.xlu1 %755 }
 0x9de   :  { %v2879_v45 = vadd.f32 %v756_v43, %v748_v42 }
 0x9e0   :  { %2394 = vtanh.f32 %v2879_v45 }
 0x9ea   :  { %v2393_v46 = vpop.eup %2392 }
 0x9eb   :  { %859 = vrot.lane.b32.xlu0 %v2393_v46, %s2529_s19 }
 0x9ed   :  { %v2395_v47 = vpop.eup %2394 }
 0x9ee   :  { %761 = vrot.lane.b32.xlu1 %v2395_v47, %s2529_s19 }
 0xa5d   :  { %v860_v48 = vpop.permute.xlu0 %859 }
 0xa5e   :  { %v862_v49 = vmul.f32 %v2389_v25, %v860_v48 }
 0xa60   :  { %864 = vrot.lane.b32.xlu1 %v862_v49, %s2530_s22  ;;  %v762_v50 = vpop.permute.xlu1 %761 }
 0xa61   :  { %v764_v51 = vmul.f32 %v2391_v28, %v762_v50 }
 0xa63   :  { %868 = vrot.lane.b32.xlu0 %v764_v51, %s2529_s19 }
 0xad2   :  { %v865_v52 = vpop.permute.xlu1 %864 }
 0xad3   :  { %2211 = vmatmul.mubr.msk.f32.vlgmr.msra.gmra.mxu0 %vm143_vm2, %v865_v52 }
 0xad4   :  { %2214 = vmatpush3.msra.mxu0 %v2675_v29  ;;  %2229 = vmatprep.mubr.msk.f32.mxu0 %vm2528_vm0, %v2527_v1 }
 0xad5   :  { %2215 = vmatprep.subr.mxu0 %v2527_v1  ;;  %v869_v53 = vpop.permute.xlu0 %868 }
 0xad6   :  { %2216 = vmatpush3.msra.mxu0 %v2680_v30  ;;  %v871_v54 = vsel %vm143_vm2, %v865_v52, %v869_v53 }
 0xad7   :  { %2217 = vmatprep.subr.mxu0 %v2527_v1  ;;  %2200 = vmatmul.mubr.msk.f32.vlgmr.msra.gmra.mxu1 %vm255_vm3, %v871_v54 }
 0xad8   :  { %2218 = vmatpush3.msra.mxu0 %v2687_v31  ;;  %2233 = vmatpush3.msra.mxu1 %v2611_v3 }
 0xad9   :  { %2219 = vmatprep.subr.mxu0 %v2527_v1  ;;  %2234 = vmatprep.subr.mxu1 %v2527_v1 }
 0xada   :  { %2220 = vmatpush3.msra.mxu0 %v2694_v32  ;;  %2235 = vmatpush3.msra.mxu1 %v2620_v5 }
 0xadb   :  { %2221 = vmatprep.subr.mxu0 %v2527_v1  ;;  %2236 = vmatprep.subr.mxu1 %v2527_v1 }
 0xadc   :  { %2222 = vmatpush3.msra.mxu0 %v2701_v33  ;;  %2237 = vmatpush3.msra.mxu1 %v2628_v6 }
 0xadd   :  { %2223 = vmatprep.subr.mxu0 %v2527_v1  ;;  %2238 = vmatprep.subr.mxu1 %v2527_v1 }
 0xade   :  { %2240 = vmatprep.mubr.msk.f32.mxu1 %vm2528_vm0, %v2527_v1  ;;  %2239 = vmatpush3.msra.mxu1 %v2635_v7 }
 0xadf   :  { %2224 = vmatpush3.msra.mxu0 %v2708_v34  ;;  %2243 = vmatprep.subr.mxu1 %v2527_v1 }
 0xae0   :  { %2225 = vmatprep.subr.mxu0 %v2527_v1 }
 0xae1   :  { %2226 = vmatpush3.msra.mxu0 %v2715_v36 }
 0xae2   :  { %2227 = vmatprep.subr.mxu0 %v2527_v1 }
 0xae3   :  { %2228 = vmatpush3.msra.mxu0 %v2729_v38 }
 0xae4   :  { %2262 = vmatprep.subr.mxu0 %v2527_v1 }
 0xb93   :  { %v1038_v56 = vpop.f32.mrf.mxu0 }
 0xb94   :  { %v1042_v57 = vadd.f32 %v1038_v56, %v969_v55 }
 0xb95   :  { %v2212_v58 = vpop.f32.mrf.mxu0 }
 0xb96   :  { %2396 = vtanh.f32 %v1042_v57  ;;  %v1938_v0 = vmul.f32 -1.442695, %v1042_v57 }
 0xb97   :  { %v941_v59 = vpop.f32.mrf.mxu1 }
 0xb98   :  { %v942_v60 = vadd.f32 %v941_v59, %v2768_v44 }
 0xb99   :  { %v2201_v61 = vpop.f32.mrf.mxu1 }
 0xb9a   :  { %2398 = vtanh.f32 %v942_v60  ;;  %v1936_v2 = vmul.f32 -1.442695, %v942_v60 }
 0xb9b   :  { %2400 = vpow2.f32 %v1938_v0 }
 0xb9c   :  { %2402 = vpow2.f32 %v1936_v2 }
 0xba3   :  { %v2397_v62 = vpop.eup %2396 }
 0xba4   :  { %1052 = vrot.lane.b32.xlu0 %v2397_v62, %s2529_s19 }
 0xba7   :  { %v2399_v63 = vpop.eup %2398 }
 0xba8   :  { %954 = vrot.lane.b32.xlu1 %v2399_v63, %s2529_s19  ;;  %v2401_v4 = vpop.eup %2400 }
 0xba9   :  { %v1046_v8 = vadd.f32 1.0, %v2401_v4  ;;  %v2403_v9 = vpop.eup %2402 }
 0xbaa   :  { %v948_v10 = vadd.f32 1.0, %v2403_v9 }
 0xbab   :  { %2404 = vrcp.f32 %v1046_v8 }
 0xbac   :  { %2406 = vrcp.f32 %v948_v10 }
 0xbb8   :  { %v2405_v11 = vpop.eup %2404 }
 0xbb9   :  { %v2407_v14 = vpop.eup %2406  ;;  %v1050_v17 = vmul.f32 %v2405_v11, %v2875_v41 }
 0xbba   :  { %v952_v20 = vmul.f32 %v2407_v14, %v2879_v45 }
 0xc16   :  { %v1053_v12 = vpop.permute.xlu0 %1052 }
 0xc17   :  { %v1055_v13 = vmul.f32 %v2405_v11, %v1053_v12 }
 0xc19   :  { %1057 = vrot.lane.b32.xlu0 %v1055_v13, %s2530_s22 }
 0xc1a   :  { %v955_v15 = vpop.permute.xlu1 %954 }
 0xc1b   :  { %v957_v16 = vmul.f32 %v2407_v14, %v955_v15 }
 0xc1d   :  { %959 = vrot.lane.b32.xlu1 %v957_v16, %s2530_s22 }
 0xc8b   :  { %v1058_v18 = vpop.permute.xlu0 %1057 }
 0xc8c   :  { %v2923_v19 = vadd.f32 %v1058_v18, %v1050_v17 }
 0xc8e   :  { %2408 = vtanh.f32 %v2923_v19 }
 0xc8f   :  { %v960_v21 = vpop.permute.xlu1 %959 }
 0xc90   :  { %v2927_v22 = vadd.f32 %v960_v21, %v952_v20 }
 0xc92   :  { %2410 = vtanh.f32 %v2927_v22 }
 0xc9b   :  { %v2409_v23 = vpop.eup %2408 }
 0xc9c   :  { %1063 = vrot.lane.b32.xlu0 %v2409_v23, %s2529_s19 }
 0xc9f   :  { %v2411_v24 = vpop.eup %2410 }
 0xca0   :  { %965 = vrot.lane.b32.xlu1 %v2411_v24, %s2529_s19 }
 0xd0e   :  { %v1064_v25 = vpop.permute.xlu0 %1063 }
 0xd0f   :  { %v1066_v26 = vmul.f32 %v2405_v11, %v1064_v25 }
 0xd11   :  { %1068 = vrot.lane.b32.xlu1 %v1066_v26, %s2530_s22 }
 0xd12   :  { %v966_v27 = vpop.permute.xlu1 %965 }
 0xd13   :  { %v968_v28 = vmul.f32 %v2407_v14, %v966_v27 }
 0xd15   :  { %1072 = vrot.lane.b32.xlu0 %v968_v28, %s2529_s19 }
 0xd83   :  { %v1069_v35 = vpop.permute.xlu1 %1068 }
 0xd84   :  { %2241 = vmatmul.mubr.msk.f32.vlgmr.msra.gmra.mxu1 %vm143_vm2, %v1069_v35 }
 0xd85   :  { %2244 = vmatpush3.msra.mxu1 %v2675_v29  ;;  %2259 = vmatprep.mubr.msk.f32.mxu1 %vm2528_vm0, %v2527_v1 }
 0xd86   :  { %2245 = vmatprep.subr.mxu1 %v2527_v1 }
 0xd87   :  { %2246 = vmatpush3.msra.mxu1 %v2680_v30  ;;  %v1073_v37 = vpop.permute.xlu0 %1072 }
 0xd88   :  { %2247 = vmatprep.subr.mxu1 %v2527_v1  ;;  %v1075_v39 = vsel %vm143_vm2, %v1069_v35, %v1073_v37 }
 0xd89   :  { %2248 = vmatpush3.msra.mxu1 %v2687_v31  ;;  %2230 = vmatmul.mubr.msk.f32.vlgmr.msra.gmra.mxu0 %vm255_vm3, %v1075_v39 }
 0xd8a   :  { %2249 = vmatprep.subr.mxu1 %v2527_v1  ;;  %2263 = vmatpush3.msra.mxu0 %v2611_v3  ;;  %v1173_v3 = vld [vmem:[#allocation2 + $0x5] sm:$0x1] }
 0xd8b   :  { %2250 = vmatpush3.msra.mxu1 %v2694_v32  ;;  %2264 = vmatprep.subr.mxu0 %v2527_v1 }
 0xd8c   :  { %2251 = vmatprep.subr.mxu1 %v2527_v1  ;;  %2265 = vmatpush3.msra.mxu0 %v2620_v5 }
 0xd8d   :  { %2252 = vmatpush3.msra.mxu1 %v2701_v33  ;;  %2266 = vmatprep.subr.mxu0 %v2527_v1 }
 0xd8e   :  { %2270 = vmatprep.mubr.msk.f32.mxu0 %vm2528_vm0, %v2527_v1  ;;  %2267 = vmatpush3.msra.mxu0 %v2628_v6 }
 0xd8f   :  { %2253 = vmatprep.subr.mxu1 %v2527_v1  ;;  %2268 = vmatprep.subr.mxu0 %v2527_v1 }
 0xd90   :  { %2254 = vmatpush3.msra.mxu1 %v2708_v34  ;;  %2269 = vmatpush3.msra.mxu0 %v2635_v7 }
 0xd91   :  { %2255 = vmatprep.subr.mxu1 %v2527_v1  ;;  %2273 = vmatprep.subr.mxu0 %v2527_v1 }
 0xd92   :  { %2256 = vmatpush3.msra.mxu1 %v2715_v36 }
 0xd93   :  { %2257 = vmatprep.subr.mxu1 %v2527_v1 }
 0xd94   :  { %2258 = vmatpush3.msra.mxu1 %v2729_v38 }
 0xd95   :  { %2292 = vmatprep.subr.mxu1 %v2527_v1 }
 0xe44   :  { %v1242_v5 = vpop.f32.mrf.mxu1 }
 0xe45   :  { %v1246_v40 = vadd.f32 %v1242_v5, %v1173_v3 }
 0xe46   :  { %v2242_v41 = vpop.f32.mrf.mxu1 }
 0xe47   :  { %2412 = vtanh.f32 %v1246_v40  ;;  %v1942_v48 = vmul.f32 -1.442695, %v1246_v40 }
 0xe49   :  { %v1145_v42 = vpop.f32.mrf.mxu0 }
 0xe4a   :  { %v1146_v43 = vadd.f32 %v1145_v42, %v2768_v44 }
 0xe4b   :  { %v2231_v45 = vpop.f32.mrf.mxu0 }
 0xe4c   :  { %2414 = vtanh.f32 %v1146_v43  ;;  %v1940_v49 = vmul.f32 -1.442695, %v1146_v43 }
 0xe4d   :  { %2416 = vpow2.f32 %v1942_v48 }
 0xe4e   :  { %2418 = vpow2.f32 %v1940_v49  ;;  %v2474_v49 = vld [vmem:[%s3128_s4 + $0x38] sm:$0xff] }
 0xe54   :  { %v2413_v46 = vpop.eup %2412 }
 0xe55   :  { %1256 = vrot.lane.b32.xlu0 %v2413_v46, %s2529_s19 }
 0xe59   :  { %v2415_v47 = vpop.eup %2414 }
 0xe5a   :  { %1158 = vrot.lane.b32.xlu1 %v2415_v47, %s2529_s19  ;;  %v2417_v50 = vpop.eup %2416 }
 0xe5b   :  { %v1250_v51 = vadd.f32 1.0, %v2417_v50  ;;  %v2419_v52 = vpop.eup %2418  ;;  %v2475_v50 = vld [vmem:[%s3128_s4 + $0x30] sm:$0xff] }
 0xe5c   :  { %v1152_v53 = vadd.f32 1.0, %v2419_v52 }
 0xe5d   :  { %2420 = vrcp.f32 %v1250_v51  ;;  %v2476_v51 = vld [vmem:[%s3128_s4 + $0x28] sm:$0xff] }
 0xe5e   :  { %2422 = vrcp.f32 %v1152_v53 }
 0xe6a   :  { %v2421_v54 = vpop.eup %2420 }
 0xe6b   :  { %v2423_v57 = vpop.eup %2422  ;;  %v1254_v60 = vmul.f32 %v2421_v54, %v2923_v19 }
 0xe6c   :  { %v1156_v63 = vmul.f32 %v2423_v57, %v2927_v22 }
 0xec7   :  { %v1257_v55 = vpop.permute.xlu0 %1256 }
 0xec8   :  { %v1259_v56 = vmul.f32 %v2421_v54, %v1257_v55  ;;  %v2478_v55 = vld [vmem:[%s3128_s4 + $0x18] sm:$0xff] }
 0xeca   :  { %1261 = vrot.lane.b32.xlu0 %v1259_v56, %s2530_s22  ;;  %v2479_v56 = vld [vmem:[%s3128_s4 + $0x10] sm:$0xff] }
 0xecc   :  { %v1159_v58 = vpop.permute.xlu1 %1158 }
 0xecd   :  { %v1161_v59 = vmul.f32 %v2423_v57, %v1159_v58  ;;  %v2481_v58 = vld [vmem:[%s3128_s4] sm:$0xff] }
 0xecf   :  { %1163 = vrot.lane.b32.xlu1 %v1161_v59, %s2530_s22  ;;  %v1581_v59 = vld [vmem:[#allocation2 + $0x7] sm:$0x1] }
 0xf3c   :  { %v1262_v61 = vpop.permute.xlu0 %1261 }
 0xf3d   :  { %v2971_v62 = vadd.f32 %v1262_v61, %v1254_v60 }
 0xf3f   :  { %2424 = vtanh.f32 %v2971_v62 }
 0xf41   :  { %v1164_v0 = vpop.permute.xlu1 %1163 }
 0xf42   :  { %v2975_v2 = vadd.f32 %v1164_v0, %v1156_v63 }
 0xf44   :  { %2426 = vtanh.f32 %v2975_v2 }
 0xf4c   :  { %v2425_v4 = vpop.eup %2424 }
 0xf4d   :  { %1267 = vrot.lane.b32.xlu0 %v2425_v4, %s2529_s19 }
 0xf51   :  { %v2427_v8 = vpop.eup %2426 }
 0xf52   :  { %1169 = vrot.lane.b32.xlu1 %v2427_v8, %s2529_s19 }
 0xfbf   :  { %v1268_v9 = vpop.permute.xlu0 %1267 }
 0xfc0   :  { %v1270_v10 = vmul.f32 %v2421_v54, %v1268_v9  ;;  %v2477_v54 = vld [vmem:[%s3128_s4 + $0x20] sm:$0xff] }
 0xfc2   :  { %1272 = vrot.lane.b32.xlu1 %v1270_v10, %s2530_s22 }
 0xfc4   :  { %v1170_v11 = vpop.permute.xlu1 %1169 }
 0xfc5   :  { %v1172_v12 = vmul.f32 %v2423_v57, %v1170_v11  ;;  %v2480_v57 = vld [vmem:[%s3128_s4 + $0x8] sm:$0xff] }
 0xfc7   :  { %1276 = vrot.lane.b32.xlu0 %v1172_v12, %s2529_s19 }
0x1034   :  { %v1273_v13 = vpop.permute.xlu1 %1272 }
0x1035   :  { %2271 = vmatmul.mubr.msk.f32.vlgmr.msra.gmra.mxu0 %vm143_vm2, %v1273_v13 }
0x1036   :  { %2274 = vmatpush3.msra.mxu0 %v2675_v29  ;;  %2289 = vmatprep.mubr.msk.f32.mxu0 %vm2528_vm0, %v2527_v1  ;;  %v2472_v29 = vld [vmem:[%s3127_s3 + $0x18] sm:$0xff] }
0x1037   :  { %2275 = vmatprep.subr.mxu0 %v2527_v1 }
0x1038   :  { %2276 = vmatpush3.msra.mxu0 %v2680_v30  ;;  %v2473_v30 = vld [vmem:[%s3127_s3 + $0x10] sm:$0xff] }
0x1039   :  { %2277 = vmatprep.subr.mxu0 %v2527_v1  ;;  %v1277_v14 = vpop.permute.xlu0 %1276 }
0x103a   :  { %2278 = vmatpush3.msra.mxu0 %v2687_v31  ;;  %v1279_v15 = vsel %vm143_vm2, %v1273_v13, %v1277_v14  ;;  %v1377_v31 = vld [vmem:[#allocation2 + $0x6] sm:$0x1] }
0x103b   :  { %2279 = vmatprep.subr.mxu0 %v2527_v1  ;;  %2260 = vmatmul.mubr.msk.f32.vlgmr.msra.gmra.mxu1 %vm255_vm3, %v1279_v15 }
0x103c   :  { %2280 = vmatpush3.msra.mxu0 %v2694_v32  ;;  %2293 = vmatpush3.msra.mxu1 %v2472_v29 }
0x103d   :  { %2281 = vmatprep.subr.mxu0 %v2527_v1  ;;  %2294 = vmatprep.subr.mxu1 %v2527_v1 }
0x103e   :  { %2300 = vmatprep.mubr.msk.f32.mxu1 %vm2528_vm0, %v2527_v1  ;;  %2295 = vmatpush3.msra.mxu1 %v2473_v30 }
0x103f   :  { %2282 = vmatpush3.msra.mxu0 %v2701_v33  ;;  %2296 = vmatprep.subr.mxu1 %v2527_v1 }
0x1040   :  { %2283 = vmatprep.subr.mxu0 %v2527_v1  ;;  %2297 = vmatpush3.msra.mxu1 %v2628_v6 }
0x1041   :  { %2284 = vmatpush3.msra.mxu0 %v2708_v34  ;;  %2298 = vmatprep.subr.mxu1 %v2527_v1 }
0x1042   :  { %2285 = vmatprep.subr.mxu0 %v2527_v1  ;;  %2299 = vmatpush3.msra.mxu1 %v2635_v7 }
0x1043   :  { %2286 = vmatpush3.msra.mxu0 %v2715_v36  ;;  %2303 = vmatprep.subr.mxu1 %v2527_v1 }
0x1044   :  { %2287 = vmatprep.subr.mxu0 %v2527_v1 }
0x1045   :  { %2288 = vmatpush3.msra.mxu0 %v2729_v38 }
0x1046   :  { %2322 = vmatprep.subr.mxu0 %v2527_v1 }
0x10f5   :  { %v1446_v6 = vpop.f32.mrf.mxu0 }
0x10f6   :  { %v1450_v32 = vadd.f32 %v1446_v6, %v1377_v31 }
0x10f7   :  { %v2272_v33 = vpop.f32.mrf.mxu0 }
0x10f8   :  { %2428 = vtanh.f32 %v1450_v32  ;;  %v1946_v18 = vmul.f32 -1.442695, %v1450_v32 }
0x10fb   :  { %v1349_v34 = vpop.f32.mrf.mxu1 }
0x10fc   :  { %v1350_v16 = vadd.f32 %v1349_v34, %v2768_v44 }
0x10fd   :  { %v2261_v17 = vpop.f32.mrf.mxu1 }
0x10fe   :  { %2430 = vtanh.f32 %v1350_v16  ;;  %v1944_v38 = vmul.f32 -1.442695, %v1350_v16 }
0x10ff   :  { %2432 = vpow2.f32 %v1946_v18 }
0x1100   :  { %2434 = vpow2.f32 %v1944_v38 }
0x1105   :  { %v2429_v7 = vpop.eup %2428 }
0x1106   :  { %1460 = vrot.lane.b32.xlu0 %v2429_v7, %s2529_s19 }
0x110b   :  { %v2431_v36 = vpop.eup %2430 }
0x110c   :  { %1362 = vrot.lane.b32.xlu1 %v2431_v36, %s2529_s19  ;;  %v2433_v19 = vpop.eup %2432 }
0x110d   :  { %v1454_v20 = vadd.f32 1.0, %v2433_v19  ;;  %v2435_v21 = vpop.eup %2434 }
0x110e   :  { %v1356_v22 = vadd.f32 1.0, %v2435_v21 }
0x110f   :  { %2436 = vrcp.f32 %v1454_v20 }
0x1110   :  { %2438 = vrcp.f32 %v1356_v22 }
0x111c   :  { %v2437_v23 = vpop.eup %2436 }
0x111d   :  { %v2439_v26 = vpop.eup %2438  ;;  %v1458_v35 = vmul.f32 %v2437_v23, %v2971_v62 }
0x111e   :  { %v1360_v3 = vmul.f32 %v2439_v26, %v2975_v2 }
0x1178   :  { %v1461_v24 = vpop.permute.xlu0 %1460 }
0x1179   :  { %v1463_v25 = vmul.f32 %v2437_v23, %v1461_v24 }
0x117b   :  { %1465 = vrot.lane.b32.xlu0 %v1463_v25, %s2530_s22 }
0x117e   :  { %v1363_v27 = vpop.permute.xlu1 %1362 }
0x117f   :  { %v1365_v28 = vmul.f32 %v2439_v26, %v1363_v27 }
0x1181   :  { %1367 = vrot.lane.b32.xlu1 %v1365_v28, %s2530_s22 }
0x11ed   :  { %v1466_v37 = vpop.permute.xlu0 %1465 }
0x11ee   :  { %v3023_v39 = vadd.f32 %v1466_v37, %v1458_v35 }
0x11f0   :  { %2440 = vtanh.f32 %v3023_v39 }
0x11f3   :  { %v1368_v5 = vpop.permute.xlu1 %1367 }
0x11f4   :  { %v3027_v40 = vadd.f32 %v1368_v5, %v1360_v3 }
0x11f6   :  { %2442 = vtanh.f32 %v3027_v40 }
0x11fd   :  { %v2441_v41 = vpop.eup %2440 }
0x11fe   :  { %1471 = vrot.lane.b32.xlu0 %v2441_v41, %s2529_s19 }
0x1203   :  { %v2443_v42 = vpop.eup %2442 }
0x1204   :  { %1373 = vrot.lane.b32.xlu1 %v2443_v42, %s2529_s19 }
0x1270   :  { %v1472_v43 = vpop.permute.xlu0 %1471 }
0x1271   :  { %v1474_v45 = vmul.f32 %v2437_v23, %v1472_v43 }
0x1273   :  { %1476 = vrot.lane.b32.xlu1 %v1474_v45, %s2530_s22 }
0x1276   :  { %v1374_v46 = vpop.permute.xlu1 %1373 }
0x1277   :  { %v1376_v47 = vmul.f32 %v2439_v26, %v1374_v46  ;;  %v2482_v26 = vld [vmem:[%s3129_s5] sm:$0x1]  ;;  %v1788_v46 = vld [vmem:[%s3130_s6 + $0x18] sm:$0xff] }
0x1279   :  { %1480 = vrot.lane.b32.xlu0 %v1376_v47, %s2529_s19  ;;  %v1787_v47 = vld [vmem:[%s3130_s6 + $0x10] sm:$0xff] }
0x12e5   :  { %v1477_v48 = vpop.permute.xlu1 %1476 }
0x12e6   :  { %2301 = vmatmul.mubr.msk.f32.vlgmr.msra.gmra.mxu1 %vm143_vm2, %v1477_v48 }
0x12e7   :  { %2304 = vmatpush3.msra.mxu1 %v2474_v49  ;;  %2319 = vmatprep.mubr.msk.f32.mxu1 %vm2528_vm0, %v2527_v1  ;;  %v1785_v49 = vld [vmem:[%s3130_s6] sm:$0xff] }
0x12e8   :  { %2305 = vmatprep.subr.mxu1 %v2527_v1 }
0x12e9   :  { %2306 = vmatpush3.msra.mxu1 %v2475_v50 }
0x12ea   :  { %2307 = vmatprep.subr.mxu1 %v2527_v1 }
0x12eb   :  { %2308 = vmatpush3.msra.mxu1 %v2476_v51  ;;  %v1481_v52 = vpop.permute.xlu0 %1480 }
0x12ec   :  { %2309 = vmatprep.subr.mxu1 %v2527_v1  ;;  %v1483_v53 = vsel %vm143_vm2, %v1477_v48, %v1481_v52  ;;  %v1786_v48 = vld [vmem:[%s3130_s6 + $0x8] sm:$0xff]  ;;  %s2532_s6 = smov [#allocation3]  }
0x12ed   :  { %2310 = vmatpush3.msra.mxu1 %v2477_v54  ;;  %2290 = vmatmul.mubr.msk.f32.vlgmr.msra.gmra.mxu0 %vm255_vm3, %v1483_v53 }
0x12ee   :  { %2311 = vmatprep.subr.mxu1 %v2527_v1  ;;  %2330 = vmatprep.mubr.msk.f32.mxu0 %vm2528_vm0, %v2527_v1 }
0x12ef   :  { %2312 = vmatpush3.msra.mxu1 %v2478_v55  ;;  %2323 = vmatpush3.msra.mxu0 %v1788_v46 }
0x12f0   :  { %2313 = vmatprep.subr.mxu1 %v2527_v1  ;;  %2324 = vmatprep.subr.mxu0 %v2527_v1 }
0x12f1   :  { %2314 = vmatpush3.msra.mxu1 %v2479_v56  ;;  %2325 = vmatpush3.msra.mxu0 %v1787_v47 }
0x12f2   :  { %2315 = vmatprep.subr.mxu1 %v2527_v1  ;;  %2326 = vmatprep.subr.mxu0 %v2527_v1 }
0x12f3   :  { %2316 = vmatpush3.msra.mxu1 %v2480_v57  ;;  %2327 = vmatpush3.msra.mxu0 %v1786_v48 }
0x12f4   :  { %2317 = vmatprep.subr.mxu1 %v2527_v1  ;;  %2328 = vmatprep.subr.mxu0 %v2527_v1 }
0x12f5   :  { %2318 = vmatpush3.msra.mxu1 %v2481_v58  ;;  %2329 = vmatpush3.msra.mxu0 %v1785_v49 }
0x13a6   :  { %v1650_v60 = vpop.f32.mrf.mxu1 }
0x13a7   :  { %v1654_v61 = vadd.f32 %v1650_v60, %v1581_v59 }
0x13a8   :  { %v2302_v62 = vpop.f32.mrf.mxu1 }
0x13a9   :  { %2444 = vtanh.f32 %v1654_v61  ;;  %v1950_v9 = vmul.f32 -1.442695, %v1654_v61 }
0x13ad   :  { %v1553_v63 = vpop.f32.mrf.mxu0 }
0x13ae   :  { %v1554_v0 = vadd.f32 %v1553_v63, %v2768_v44 }
0x13af   :  { %v2291_v2 = vpop.f32.mrf.mxu0 }
0x13b0   :  { %2446 = vtanh.f32 %v1554_v0  ;;  %v1948_v10 = vmul.f32 -1.442695, %v1554_v0 }
0x13b1   :  { %2448 = vpow2.f32 %v1950_v9 }
0x13b2   :  { %2450 = vpow2.f32 %v1948_v10 }
0x13b6   :  { %v2445_v4 = vpop.eup %2444 }
0x13b7   :  { %1664 = vrot.lane.b32.xlu0 %v2445_v4, %s2529_s19 }
0x13bd   :  { %v2447_v8 = vpop.eup %2446 }
0x13be   :  { %1566 = vrot.lane.b32.xlu1 %v2447_v8, %s2529_s19  ;;  %v2449_v11 = vpop.eup %2448 }
0x13bf   :  { %v1658_v12 = vadd.f32 1.0, %v2449_v11  ;;  %v2451_v13 = vpop.eup %2450 }
0x13c0   :  { %v1560_v14 = vadd.f32 1.0, %v2451_v13 }
0x13c1   :  { %2452 = vrcp.f32 %v1658_v12 }
0x13c2   :  { %2454 = vrcp.f32 %v1560_v14 }
0x13ce   :  { %v2453_v15 = vpop.eup %2452 }
0x13cf   :  { %v2455_v30 = vpop.eup %2454  ;;  %v1662_v32 = vmul.f32 %v2453_v15, %v3023_v39 }
0x13d0   :  { %v1564_v16 = vmul.f32 %v2455_v30, %v3027_v40 }
0x1429   :  { %v1665_v44 = vpop.permute.xlu0 %1664 }
0x142a   :  { %v1667_v29 = vmul.f32 %v2453_v15, %v1665_v44 }
0x142c   :  { %1669 = vrot.lane.b32.xlu0 %v1667_v29, %s2530_s22 }
0x1430   :  { %v1567_v31 = vpop.permute.xlu1 %1566 }
0x1431   :  { %v1569_v6 = vmul.f32 %v2455_v30, %v1567_v31 }
0x1433   :  { %1571 = vrot.lane.b32.xlu1 %v1569_v6, %s2530_s22 }
0x149e   :  { %v1670_v33 = vpop.permute.xlu0 %1669 }
0x149f   :  { %v1672_v34 = vadd.f32 %v1670_v33, %v1662_v32 }
0x14a1   :  { %2456 = vtanh.f32 %v1672_v34 }
0x14a5   :  { %v1572_v17 = vpop.permute.xlu1 %1571 }
0x14a6   :  { %v1574_v7 = vadd.f32 %v1572_v17, %v1564_v16 }
0x14a8   :  { %2458 = vtanh.f32 %v1574_v7 }
0x14ae   :  { %v2457_v36 = vpop.eup %2456 }
0x14af   :  { %1675 = vrot.lane.b32.xlu0 %v2457_v36, %s2529_s19 }
0x14b5   :  { %v2459_v18 = vpop.eup %2458 }
0x14b6   :  { %1577 = vrot.lane.b32.xlu1 %v2459_v18, %s2529_s19 }
0x1521   :  { %v1676_v38 = vpop.permute.xlu0 %1675 }
0x1522   :  { %v1678_v19 = vmul.f32 %v2453_v15, %v1676_v38 }
0x1524   :  { %1680 = vrot.lane.b32.xlu1 %v1678_v19, %s2530_s22 }
0x1528   :  { %v1578_v20 = vpop.permute.xlu1 %1577 }
0x1529   :  { %v1580_v21 = vmul.f32 %v2455_v30, %v1578_v20 }
0x152b   :  { %1684 = vrot.lane.b32.xlu0 %v1580_v21, %s2529_s19 }
0x1596   :  { %v1681_v22 = vpop.permute.xlu1 %1680 }
0x1597   :  { %1874 = vst.msk [vmem:[#allocation3] sm:$0x1] %vm1873_vm4, %v1681_v22 }
0x159d   :  { %v1685_v23 = vpop.permute.xlu0 %1684 }
0x159e   :  { %v1687_v24 = vsel %vm143_vm2, %v1681_v22, %v1685_v23 }
0x159f   :  { %2320 = vmatmul.mubr.msk.f32.vlgmr.msra.gmra.mxu1 %vm255_vm3, %v1687_v24 }
0x165f   :  { %v1757_v25 = vpop.f32.mrf.mxu1 }
0x1660   :  { %v1758_v27 = vadd.f32 %v2482_v26, %v1757_v25 }
0x1661   :  { %v2321_v28 = vpop.f32.mrf.mxu1 }
0x1662   :  { %2460 = vtanh.f32 %v1758_v27  ;;  %v1952_v37 = vmul.f32 -1.442695, %v1758_v27 }
0x1664   :  { %2462 = vpow2.f32 %v1952_v37 }
0x166f   :  { %v2461_v35 = vpop.eup %2460 }
0x1670   :  { %1770 = vrot.lane.b32.xlu1 %v2461_v35, %s2529_s19 }
0x1671   :  { %v2463_v39 = vpop.eup %2462 }
0x1672   :  { %v1764_v3 = vadd.f32 1.0, %v2463_v39 }
0x1674   :  { %2464 = vrcp.f32 %v1764_v3 }
0x1681   :  { %v2465_v5 = vpop.eup %2464 }
0x1682   :  { %v1768_v42 = vmul.f32 %v2465_v5, %v1574_v7 }
0x16e2   :  { %v1771_v40 = vpop.permute.xlu1 %1770 }
0x16e3   :  { %v1773_v41 = vmul.f32 %v2465_v5, %v1771_v40 }
0x16e5   :  { %1775 = vrot.lane.b32.xlu0 %v1773_v41, %s2530_s22 }
0x1757   :  { %v1776_v43 = vpop.permute.xlu0 %1775 }
0x1758   :  { %v1778_v45 = vadd.f32 %v1776_v43, %v1768_v42 }
0x175a   :  { %2466 = vtanh.f32 %v1778_v45 }
0x1767   :  { %v2467_v50 = vpop.eup %2466 }
0x1768   :  { %1781 = vrot.lane.b32.xlu1 %v2467_v50, %s2529_s19  ;;  %s1895_s19 = sshll.u32 %s2532_s6, 4  ;;  %s1896_s19 = int_to_ptr.vmem [resolvable:$true] %s1895_s19 }
0x1769   :  { %s2483_s1 = scalar_lea.vmem %s1896_s19, 32  ;;  %p2488_p1 = scmp.lt.s32.totalorder %s1896_s19, %s1896_s19 }
0x176a   :  { %p2484_p0 = scmp.ne.s32.totalorder %s1896_s19, %s2483_s1  ;;  %p2489_p2 = scmp.lt.s32.totalorder %s2483_s1, %s2483_s1 }
0x176c   :  { %1878 = vrot.lane.b32.xlu1 %v1672_v34, %s2531_s28  ;;  %p2490_p3 = por %p2489_p2, %p2488_p1 }
0x176e   :  { %p2491_p4 = pnand %p2490_p3, %p2484_p0 }
0x17da   :  { %v1782_v51 = vpop.permute.xlu1 %1781 }
0x17db   :  { %v1784_v52 = vmul.f32 %v2465_v5, %v1782_v51 }
0x17dd   :  { %1791 = vrot.lane.b32.xlu0 %v1784_v52, %s2530_s22 }
0x17de   :  { %v1879_v53 = vpop.permute.xlu1 %1878 }
0x17df   :  { %1881 = vst.msk [vmem:[#allocation5] sm:$0x1] %vm1873_vm4, %v1879_v53 }
0x17e1   :  { %1883 = vrot.lane.b32.xlu0 %v1778_v45, %s2531_s28 }
0x184f   :  { %v1792_v54 = vpop.permute.xlu0 %1791 }
0x1850   :  { %1876 = vst.msk [vmem:[#allocation3 + $0x1] sm:$0x1] %vm1873_vm4, %v1792_v54  ;;  %2331 = vmatmul.mubr.msk.f32.vlgmr.msra.gmra.mxu0 %vm143_vm2, %v1792_v54 }
0x1853   :  { %v1884_v55 = vpop.permute.xlu0 %1883 }
0x1854   :  { %1886 = vst.msk [vmem:[#allocation5 + $0x1] sm:$0x1] %vm1873_vm4, %v1884_v55 }
0x1855   :  { %2494 = shalt.err (!%p2491_p4)
}
0x1856   :  { %1898 = dma.vmem_to_hbm [thread:$0]  %s1896_s19, 32, %s3135_s11, [#allocation4]  }
0x1857   :  { %s2503_s0 = scalar_lea.vmem %s1906_s30, 32  ;;  %p2508_p6 = scmp.lt.s32.totalorder %s1906_s30, %s1906_s30 }
0x1858   :  { %p2504_p5 = scmp.ne.s32.totalorder %s1906_s30, %s2503_s0  ;;  %p2509_p7 = scmp.lt.s32.totalorder %s2503_s0, %s2503_s0 }
0x185a   :  { %p2510_p8 = por %p2509_p7, %p2508_p6 }
0x185c   :  { %p2511_p9 = pnand %p2510_p8, %p2504_p5 }
0x185e   :  { %2514 = shalt.err (!%p2511_p9)
}
0x185f   :  { %1908 = dma.vmem_to_hbm [thread:$0]  %s1906_s30, 32, %s3136_s12, [#allocation6]   ;;  %v1789_v1 = vld [vmem:[%s3131_s7] sm:$0x1]  ;;  %vm1871_vm5 = vcmask 57344  }
0x1910   :  { %v1861_v56 = vpop.f32.mrf.mxu0 }
0x1911   :  { %v1862_v57 = vadd.f32 %v1861_v56, %v1789_v1 }
0x1912   :  { %v2332_v58 = vpop.f32.mrf.mxu0 }
0x1913   :  { %v1954_v59 = vmul.f32 -1.442695, %v1862_v57 }
0x1915   :  { %2468 = vpow2.f32 %v1954_v59 }
0x1922   :  { %v2469_v60 = vpop.eup %2468 }
0x1923   :  { %v1868_v61 = vadd.f32 1.0, %v2469_v60 }
0x1925   :  { %2470 = vrcp.f32 %v1868_v61 }
0x1932   :  { %v2471_v62 = vpop.eup %2470 }
0x1933   :  { %1872 = vst.msk [vmem:[%s3134_s10] sm:$0x1] %vm1871_vm5, %v2471_v62 }
0x1934   :  { %2523 = dma.done.wait [#allocation4], 32  }
0x1935   :  { %2524 = vsyncadd [#allocation4], 4294967264 }
0x1936   :  { %2525 = dma.done.wait [#allocation6], 32  }
0x1937   :  { %2526 = vsyncadd [#allocation6], 4294967264 }
0x1938   :  { %1917 = vsyncpa [#allocation4], 1 }
0x1939   :  { %1918 = vsyncpa [#allocation6], 1 }

</bundles_post_ra>
